<compile_context>
chip_gen: v6e
topology: v6e:2x2x1
jax: 0.10.0
libtpu: 0.0.40
codegen_flags: <defaults>
</compile_context>

<pallas_src>
from functools import partial

import numpy as np
import jax
import jax.numpy as jnp
from jax import lax
from jax.experimental import pallas as pl
from jax.experimental.pallas import tpu as pltpu

N_CLASS = 10        # the PyTorch module references a global `n_class`; fixed here.
N_CLASS_PAD = 128   # lane-dense padded logits width (sliced back in the wrapper)
NEG_BIG = -1e30     # bias of padded classes -> softmax probability exactly 0


# --------------------------------------------------------------------------
# host-side weight preparation (runs once, outside the kernel)
# --------------------------------------------------------------------------

def conv_to_banded(w, w_in):
    """Fold a (Cout, Cin, KH, KW) conv weight into a banded GEMM matrix.

    Feature maps are laid out as (H, Cin*W_in) with w fastest.  The returned
    matrix M has shape (KH*Cin*W_in, Cout*W_out) with
        M[dy*Cin*W_in + ci*W_in + wc, co*W_out + j] = w[co, ci, dy, wc - j]
    (zero where wc - j is outside [0, KW)).  A valid-convolution output row i
    is then  y[i, :] = sum_dy x[i+dy, :] @ M[dy*Cin*W_in:(dy+1)*Cin*W_in, :]
    with output layout (H_out, Cout*W_out), w fastest.
    """
    c_out, c_in, kh, kw = w.shape
    w_out = w_in - kw + 1
    wc = np.arange(w_in)[:, None]                  # (W_in, 1)
    jj = np.arange(w_out)[None, :]                 # (1, W_out)
    dx = wc - jj                                   # (W_in, W_out)
    valid = (dx >= 0) & (dx < kw)
    dx = np.clip(dx, 0, kw - 1)
    g = w[:, :, :, dx]                             # (Cout, Cin, KH, W_in, W_out)
    g = g * jnp.asarray(valid, w.dtype)[None, None, None]
    g = jnp.transpose(g, (2, 1, 3, 0, 4))          # (KH, Cin, W_in, Cout, W_out)
    return g.reshape(kh * c_in * w_in, c_out * w_out)


def _even_col_selector(n_in, n_out):
    """0/1 (n_in, n_out) matrix; output column j selects input column 2j."""
    m = np.zeros((n_in, n_out), np.float32)
    m[2 * np.arange(n_out), np.arange(n_out)] = 1.0
    return m


def init_raw_params(key, n_class=N_CLASS, scale=0.1):
    """PyTorch-layout parameters (Conv: (O, I, kh, kw); Linear: (out, in))."""
    ks = jax.random.split(key, 10)
    return {
        "w1": scale * jax.random.normal(ks[0], (6, 1, 1, 1), jnp.float32),
        "b1": scale * jax.random.normal(ks[1], (6,), jnp.float32),
        "w2": scale * jax.random.normal(ks[2], (16, 6, 5, 5), jnp.float32),
        "b2": scale * jax.random.normal(ks[3], (16,), jnp.float32),
        "w3": scale * jax.random.normal(ks[4], (120, 16, 5, 5), jnp.float32),
        "b3": scale * jax.random.normal(ks[5], (120,), jnp.float32),
        "wf1": scale * jax.random.normal(ks[6], (84, 120), jnp.float32),
        "bf1": scale * jax.random.normal(ks[7], (84,), jnp.float32),
        "wf2": scale * jax.random.normal(ks[8], (n_class, 84), jnp.float32),
        "bf2": scale * jax.random.normal(ks[9], (n_class,), jnp.float32),
    }


def prep_params(raw):
    """Convert PyTorch-layout params into the fused kernel's GEMM/row layouts."""
    n_class = raw["wf2"].shape[0]
    assert n_class <= N_CLASS_PAD

    # conv1 (1x1, 1->6): per-channel scale split by sign so the 2x2 max pool can
    # be applied to x itself (max over window of s*x+b = s_pos*max + s_neg*min + b).
    s = raw["w1"].reshape(6)
    spos = jnp.repeat(jnp.maximum(s, 0.0), 14)[None, :]            # (1, 84)
    sneg = jnp.repeat(jnp.minimum(s, 0.0), 14)[None, :]            # (1, 84)
    b1r = jnp.repeat(raw["b1"], 14)[None, :]                       # (1, 84)

    # pool1 stride-2 selectors (hoisted out of the kernel, loop-invariant).
    s27 = _even_col_selector(27, 14)                               # (27, 14)
    selc1 = np.zeros((54, 28), np.float32)                         # [max | min] halves
    selc1[:27, :14] = s27
    selc1[27:, 14:] = s27
    selr1 = np.ascontiguousarray(s27.T)                            # (14, 27)
    selr2 = np.ascontiguousarray(_even_col_selector(9, 5).T)       # (5, 9)

    # conv2 (5x5, 6->16) as a single banded GEMM: rows dy-major, then ci, then w.
    w2 = conv_to_banded(raw["w2"], 14)                             # (420, 160)
    b2r = jnp.repeat(raw["b2"], 10)[None, :]                       # (1, 160)

    # conv3 (5x5, 16->120) banded GEMM with pool2's stride-2 column selection
    # folded in (contraction runs over the un-selected 159 lanes per dy).
    selc2 = np.zeros((159, 80), np.float32)
    for ci in range(16):
        for dx in range(5):
            selc2[ci * 10 + 2 * dx, ci * 5 + dx] = 1.0
    m3 = conv_to_banded(raw["w3"], 5)                              # (400, 120)
    selc2_j = jnp.asarray(selc2)
    w3f = jnp.concatenate(
        [selc2_j @ m3[dy * 80:(dy + 1) * 80, :] for dy in range(5)], axis=0)  # (795,120)
    b3r = raw["b3"][None, :]                                       # (1, 120)

    # classifier; fc2 lane-padded to 128 classes, pad bias -> prob exactly 0.
    wf2p = jnp.zeros((84, N_CLASS_PAD), jnp.float32).at[:, :n_class].set(raw["wf2"].T)
    bf2p = jnp.full((1, N_CLASS_PAD), NEG_BIG, jnp.float32).at[0, :n_class].set(raw["bf2"])

    return {
        "selc1": jnp.asarray(selc1), "selr1": jnp.asarray(selr1),
        "selr2": jnp.asarray(selr2),
        "spos": spos, "sneg": sneg, "b1": b1r,
        "w2": w2, "b2": b2r,
        "w3": w3f, "b3": b3r,
        "wf1": raw["wf1"].T, "bf1": raw["bf1"][None, :],
        "wf2": wf2p, "bf2": bf2p,
    }


# --------------------------------------------------------------------------
# fused Pallas kernel: one batch tile per grid step
# --------------------------------------------------------------------------

def lenet5_kernel(x_ref, selc1_ref, selr1_ref, selr2_ref,
                  spos_ref, sneg_ref, b1_ref, w2_ref, b2_ref,
                  w3_ref, b3_ref, wf1_ref, bf1_ref, wf2_ref, bf2_ref,
                  o_ref, feat_ref, *, act, b_tile, unroll):
    f32 = jnp.float32
    act_fn = jnp.tanh if act == "tanh" else (lambda v: jnp.maximum(v, 0.0))

    # Loop-invariant weight loads, hoisted once per grid step.
    selc1, selr1, selr2 = selc1_ref[...], selr1_ref[...], selr2_ref[...]
    spos, sneg, b1r = spos_ref[...], sneg_ref[...], b1_ref[...]
    w2, b2r = w2_ref[...], b2_ref[...]

    def per_sample(i, carry):
        x = x_ref[i][0]                                            # (28, 28)

        # MaxPool2d(2) applied to the single input channel BEFORE the 1x1 conv:
        # max over a window of (s*x + b) == s_pos*max(x) + s_neg*min(x) + b, and
        # tanh/relu are monotone so applying them after the pool is exact.
        cmax = jnp.maximum(x[:, :27], x[:, 1:])                    # (28, 27)
        cmin = jnp.minimum(x[:, :27], x[:, 1:])                    # (28, 27)
        cm = jnp.dot(jnp.concatenate([cmax, cmin], axis=1), selc1,
                     preferred_element_type=f32)                   # (28, 28) col select
        r_a, r_b = cm[:27, :], cm[1:, :]
        rp = jnp.concatenate([jnp.maximum(r_a, r_b)[:, :14],
                              jnp.minimum(r_a, r_b)[:, 14:]], axis=1)   # (27, 28)
        p = jnp.dot(selr1, rp, preferred_element_type=f32)         # (14, 28) row select
        pmax, pmin = p[:, :14], p[:, 14:]                          # (14, 14) each

        # Conv2d(1,6,1) channels as a pure-VPU broadcast multiply + activation.
        a1 = act_fn(jnp.concatenate([pmax] * 6, axis=1) * spos
                    + jnp.concatenate([pmin] * 6, axis=1) * sneg + b1r)   # (14, 84)

        # Conv2d(6,16,5): single banded GEMM, K = 5*84 = 420.
        x2 = jnp.concatenate([a1[dy:dy + 10, :] for dy in range(5)], axis=1)  # (10, 420)
        y2 = jnp.dot(x2, w2, preferred_element_type=f32) + b2r               # (10, 160)

        # MaxPool2d(2): column pair-max (stride-2 column select is folded into
        # the conv3 weights), row pair-max + select, then activation.
        c2 = jnp.maximum(y2[:, :159], y2[:, 1:])                   # (10, 159)
        r2 = jnp.maximum(c2[:9, :], c2[1:, :])                     # (9, 159)
        a2 = act_fn(jnp.dot(selr2, r2, preferred_element_type=f32))  # (5, 159)

        # Flatten (dy-major) so conv3 becomes one batched GEMM after the loop.
        row = jnp.concatenate([a2[dy:dy + 1, :] for dy in range(5)], axis=1)  # (1, 795)
        feat_ref[pl.ds(i, 1), :] = row
        return carry

    lax.fori_loop(0, b_tile, per_sample, 0, unroll=unroll)

    # Batched tail: Conv2d(16,120,5) (spatial collapsed), classifier, softmax.
    feat = feat_ref[...]                                                     # (B, 795)
    y3 = act_fn(jnp.dot(feat, w3_ref[...], preferred_element_type=f32)
                + b3_ref[...])                                               # (B, 120)
    h = jnp.tanh(jnp.dot(y3, wf1_ref[...], preferred_element_type=f32)
                 + bf1_ref[...])                                             # (B, 84)
    logits = (jnp.dot(h, wf2_ref[...], preferred_element_type=f32)
              + bf2_ref[...])                                                # (B, 128)
    mx = jnp.max(logits, axis=-1, keepdims=True)
    e = jnp.exp(logits - mx)
    inv = pl.reciprocal(jnp.sum(e, axis=-1, keepdims=True), approx=True)
    o_ref[...] = (e * inv).astype(o_ref.dtype)


# --------------------------------------------------------------------------
# wrapper
# --------------------------------------------------------------------------

@partial(jax.jit, static_argnames=("act_func", "n_class"))
def lenet5_forward(x, params, act_func="tanh", n_class=N_CLASS):
    # x: (N, 1, 28, 28) NCHW (PyTorch layout)
    n, c_in, h, w = x.shape
    assert (c_in, h, w) == (1, 28, 28), "LeNet5 expects 1x28x28 inputs"
    act = "tanh" if act_func == "tanh" else "relu"

    # Batch-block the grid.  Padded samples are computed and sliced off.
    b_tile = min(128, n)
    n_pad = pl.cdiv(n, b_tile) * b_tile
    if n_pad != n:
        x = jnp.pad(x, ((0, n_pad - n), (0, 0), (0, 0), (0, 0)))

    weight_names = ("selc1", "selr1", "selr2", "spos", "sneg", "b1",
                    "w2", "b2", "w3", "b3", "wf1", "bf1", "wf2", "bf2")
    weights = tuple(params[k] for k in weight_names)

    def const_spec(arr):
        nd = arr.ndim
        return pl.BlockSpec(arr.shape, lambda i, _nd=nd: (0,) * _nd)

    out = pl.pallas_call(
        partial(lenet5_kernel, act=act, b_tile=b_tile, unroll=min(8, b_tile)),
        out_shape=jax.ShapeDtypeStruct((n_pad, N_CLASS_PAD), jnp.float32),
        grid=(n_pad // b_tile,),
        in_specs=[pl.BlockSpec((b_tile, 1, 28, 28), lambda i: (i, 0, 0, 0))]
                 + [const_spec(wt) for wt in weights],
        out_specs=pl.BlockSpec((b_tile, N_CLASS_PAD), lambda i: (i, 0)),
        scratch_shapes=[pltpu.VMEM((b_tile, 795), jnp.float32)],
        compiler_params=pltpu.CompilerParams(
            dimension_semantics=("parallel",)),
    )(x, *weights)
    return out[:n, :n_class]


# --------------------------------------------------------------------------
# pure-JAX reference (mirrors the PyTorch module, for verification)
# --------------------------------------------------------------------------

def lenet5_reference(x, raw, act_func="tanh"):
    actf = jnp.tanh if act_func == "tanh" else (lambda v: jnp.maximum(v, 0.0))
    dn = ("NCHW", "OIHW", "NCHW")

    y = lax.conv_general_dilated(x, raw["w1"], (1, 1), "VALID",
                                 dimension_numbers=dn)
    y = actf(y + raw["b1"][None, :, None, None])
    y = lax.reduce_window(y, -jnp.inf, lax.max, (1, 1, 2, 2), (1, 1, 2, 2),
                          "VALID")
    y = lax.conv_general_dilated(y, raw["w2"], (1, 1), "VALID",
                                 dimension_numbers=dn)
    y = actf(y + raw["b2"][None, :, None, None])
    y = lax.reduce_window(y, -jnp.inf, lax.max, (1, 1, 2, 2), (1, 1, 2, 2),
                          "VALID")
    y = lax.conv_general_dilated(y, raw["w3"], (1, 1), "VALID",
                                 dimension_numbers=dn)
    y = actf(y + raw["b3"][None, :, None, None])
    y = y.reshape(y.shape[0], -1)                      # torch.squeeze
    y = jnp.tanh(y @ raw["wf1"].T + raw["bf1"])
    y = y @ raw["wf2"].T + raw["bf2"]
    return jax.nn.softmax(y, axis=-1)


# --------------------------------------------------------------------------
# main
# --------------------------------------------------------------------------

if __name__ == "__main__":
    key = jax.random.PRNGKey(0)
    k_x, k_p = jax.random.split(key)
    # batch=2; spatial must be 28 so the conv/pool stack reduces to 1x1
    x = jax.random.normal(k_x, (2, 1, 28, 28), jnp.float32)

    raw = init_raw_params(k_p)
    params = prep_params(raw)

    for act in ("tanh", "relu"):
        out = jax.block_until_ready(lenet5_forward(x, params, act_func=act))
        assert out.shape == (2, N_CLASS)
        assert bool(jnp.all(jnp.isfinite(out)))
        # approx=True reciprocal in the softmax -> allow a few 1e-4 of slack.
        assert bool(jnp.allclose(jnp.sum(out, axis=-1), 1.0, atol=5e-3))

        ref = jax.block_until_ready(lenet5_reference(x, raw, act_func=act))
        err = float(jnp.max(jnp.abs(out - ref)))
        assert err < 5e-3, f"{act}: mismatch vs pure-JAX reference, max abs err {err}"

    print("KERNEL_OK")
</pallas_src>

<mosaic_0001>
module attributes {stable_mosaic.version = 11 : i64} {
  func.func @lenet5_kernel(%arg0: i32, %arg1: memref<2x1x28x28xf32, #tpu.memory_space<vmem>>, %arg2: memref<54x28xf32, #tpu.memory_space<vmem>>, %arg3: memref<14x27xf32, #tpu.memory_space<vmem>>, %arg4: memref<5x9xf32, #tpu.memory_space<vmem>>, %arg5: memref<1x84xf32, #tpu.memory_space<vmem>>, %arg6: memref<1x84xf32, #tpu.memory_space<vmem>>, %arg7: memref<1x84xf32, #tpu.memory_space<vmem>>, %arg8: memref<420x160xf32, #tpu.memory_space<vmem>>, %arg9: memref<1x160xf32, #tpu.memory_space<vmem>>, %arg10: memref<795x120xf32, #tpu.memory_space<vmem>>, %arg11: memref<1x120xf32, #tpu.memory_space<vmem>>, %arg12: memref<120x84xf32, #tpu.memory_space<vmem>>, %arg13: memref<1x84xf32, #tpu.memory_space<vmem>>, %arg14: memref<84x128xf32, #tpu.memory_space<vmem>>, %arg15: memref<1x128xf32, #tpu.memory_space<vmem>>, %arg16: memref<2x128xf32, #tpu.memory_space<vmem>>, %arg17: memref<2x795xf32, #tpu.memory_space<vmem>>) attributes {dimension_semantics = [#tpu.dimension_semantics<parallel>], iteration_bounds = array<i64: 1>, scalar_prefetch = 0 : i64, scratch_operands = 1 : i64, tpu.core_type = #tpu.core_type<tc>, window_params = [{transform_indices = @transform_0, window_bounds = array<i64: 2, 1, 28, 28>}, {pipeline_mode = #tpu.pipeline_mode<synchronous>, transform_indices = @transform_1, window_bounds = array<i64: 54, 28>}, {pipeline_mode = #tpu.pipeline_mode<synchronous>, transform_indices = @transform_2, window_bounds = array<i64: 14, 27>}, {pipeline_mode = #tpu.pipeline_mode<synchronous>, transform_indices = @transform_3, window_bounds = array<i64: 5, 9>}, {pipeline_mode = #tpu.pipeline_mode<synchronous>, transform_indices = @transform_4, window_bounds = array<i64: 1, 84>}, {pipeline_mode = #tpu.pipeline_mode<synchronous>, transform_indices = @transform_5, window_bounds = array<i64: 1, 84>}, {pipeline_mode = #tpu.pipeline_mode<synchronous>, transform_indices = @transform_6, window_bounds = array<i64: 1, 84>}, {pipeline_mode = #tpu.pipeline_mode<synchronous>, transform_indices = @transform_7, window_bounds = array<i64: 420, 160>}, {pipeline_mode = #tpu.pipeline_mode<synchronous>, transform_indices = @transform_8, window_bounds = array<i64: 1, 160>}, {pipeline_mode = #tpu.pipeline_mode<synchronous>, transform_indices = @transform_9, window_bounds = array<i64: 795, 120>}, {pipeline_mode = #tpu.pipeline_mode<synchronous>, transform_indices = @transform_10, window_bounds = array<i64: 1, 120>}, {pipeline_mode = #tpu.pipeline_mode<synchronous>, transform_indices = @transform_11, window_bounds = array<i64: 120, 84>}, {pipeline_mode = #tpu.pipeline_mode<synchronous>, transform_indices = @transform_12, window_bounds = array<i64: 1, 84>}, {pipeline_mode = #tpu.pipeline_mode<synchronous>, transform_indices = @transform_13, window_bounds = array<i64: 84, 128>}, {pipeline_mode = #tpu.pipeline_mode<synchronous>, transform_indices = @transform_14, window_bounds = array<i64: 1, 128>}, {transform_indices = @transform_15, window_bounds = array<i64: 2, 128>}]} {
    %c0 = arith.constant 0 : index
    %c0_0 = arith.constant 0 : index
    %0 = vector.load %arg2[%c0, %c0_0] : memref<54x28xf32, #tpu.memory_space<vmem>>, vector<54x28xf32>
    %c0_1 = arith.constant 0 : index
    %c0_2 = arith.constant 0 : index
    %1 = vector.load %arg3[%c0_1, %c0_2] : memref<14x27xf32, #tpu.memory_space<vmem>>, vector<14x27xf32>
    %c0_3 = arith.constant 0 : index
    %c0_4 = arith.constant 0 : index
    %2 = vector.load %arg4[%c0_3, %c0_4] : memref<5x9xf32, #tpu.memory_space<vmem>>, vector<5x9xf32>
    %c0_5 = arith.constant 0 : index
    %c0_6 = arith.constant 0 : index
    %3 = vector.load %arg5[%c0_5, %c0_6] : memref<1x84xf32, #tpu.memory_space<vmem>>, vector<1x84xf32>
    %c0_7 = arith.constant 0 : index
    %c0_8 = arith.constant 0 : index
    %4 = vector.load %arg6[%c0_7, %c0_8] : memref<1x84xf32, #tpu.memory_space<vmem>>, vector<1x84xf32>
    %c0_9 = arith.constant 0 : index
    %c0_10 = arith.constant 0 : index
    %5 = vector.load %arg7[%c0_9, %c0_10] : memref<1x84xf32, #tpu.memory_space<vmem>>, vector<1x84xf32>
    %c0_11 = arith.constant 0 : index
    %c0_12 = arith.constant 0 : index
    %6 = vector.load %arg8[%c0_11, %c0_12] : memref<420x160xf32, #tpu.memory_space<vmem>>, vector<420x160xf32>
    %c0_13 = arith.constant 0 : index
    %c0_14 = arith.constant 0 : index
    %7 = vector.load %arg9[%c0_13, %c0_14] : memref<1x160xf32, #tpu.memory_space<vmem>>, vector<1x160xf32>
    %c0_i32 = arith.constant 0 : i32
    %8 = arith.index_cast %c0_i32 : i32 to index
    %c0_15 = arith.constant 0 : index
    %c0_16 = arith.constant 0 : index
    %c0_17 = arith.constant 0 : index
    %9 = vector.load %arg1[%8, %c0_15, %c0_16, %c0_17] : memref<2x1x28x28xf32, #tpu.memory_space<vmem>>, vector<1x1x28x28xf32>
    %10 = vector.shape_cast %9 : vector<1x1x28x28xf32> to vector<1x28x28xf32>
    %11 = vector.shape_cast %10 : vector<1x28x28xf32> to vector<28x28xf32>
    %12 = vector.extract_strided_slice %11 {offsets = [0, 0], sizes = [28, 27], strides = [1, 1]} : vector<28x28xf32> to vector<28x27xf32>
    %13 = vector.extract_strided_slice %11 {offsets = [0, 1], sizes = [28, 27], strides = [1, 1]} : vector<28x28xf32> to vector<28x27xf32>
    %14 = arith.maximumf %12, %13 : vector<28x27xf32>
    %15 = vector.extract_strided_slice %11 {offsets = [0, 0], sizes = [28, 27], strides = [1, 1]} : vector<28x28xf32> to vector<28x27xf32>
    %16 = vector.extract_strided_slice %11 {offsets = [0, 1], sizes = [28, 27], strides = [1, 1]} : vector<28x28xf32> to vector<28x27xf32>
    %17 = arith.minimumf %15, %16 : vector<28x27xf32>
    %18 = tpu.concatenate %14, %17 in 1 : vector<28x27xf32>, vector<28x27xf32> -> vector<28x54xf32>
    %cst = arith.constant dense<0.000000e+00> : vector<28x28xf32>
    %19 = tpu.matmul %18, %0, %cst {dimension_numbers = #tpu.dot_dimension_numbers<[1], [0], [0], [1], [0, 0, 1, 1], [], []>} : vector<28x54xf32>, vector<54x28xf32>, vector<28x28xf32> -> vector<28x28xf32>
    %20 = vector.extract_strided_slice %19 {offsets = [0, 0], sizes = [27, 28], strides = [1, 1]} : vector<28x28xf32> to vector<27x28xf32>
    %21 = vector.extract_strided_slice %19 {offsets = [1, 0], sizes = [27, 28], strides = [1, 1]} : vector<28x28xf32> to vector<27x28xf32>
    %22 = arith.maximumf %20, %21 : vector<27x28xf32>
    %23 = vector.extract_strided_slice %22 {offsets = [0, 0], sizes = [27, 14], strides = [1, 1]} : vector<27x28xf32> to vector<27x14xf32>
    %24 = arith.minimumf %20, %21 : vector<27x28xf32>
    %25 = vector.extract_strided_slice %24 {offsets = [0, 14], sizes = [27, 14], strides = [1, 1]} : vector<27x28xf32> to vector<27x14xf32>
    %26 = tpu.concatenate %23, %25 in 1 : vector<27x14xf32>, vector<27x14xf32> -> vector<27x28xf32>
    %cst_18 = arith.constant dense<0.000000e+00> : vector<14x28xf32>
    %27 = tpu.matmul %1, %26, %cst_18 {dimension_numbers = #tpu.dot_dimension_numbers<[1], [0], [0], [1], [0, 0, 1, 1], [], []>} : vector<14x27xf32>, vector<27x28xf32>, vector<14x28xf32> -> vector<14x28xf32>
    %28 = vector.extract_strided_slice %27 {offsets = [0, 0], sizes = [14, 14], strides = [1, 1]} : vector<14x28xf32> to vector<14x14xf32>
    %29 = vector.extract_strided_slice %27 {offsets = [0, 14], sizes = [14, 14], strides = [1, 1]} : vector<14x28xf32> to vector<14x14xf32>
    %30 = tpu.concatenate %28, %28, %28, %28, %28, %28 in 1 : vector<14x14xf32>, vector<14x14xf32>, vector<14x14xf32>, vector<14x14xf32>, vector<14x14xf32>, vector<14x14xf32> -> vector<14x84xf32>
    %31 = vector.broadcast %3 : vector<1x84xf32> to vector<14x84xf32>
    %32 = arith.mulf %30, %31 : vector<14x84xf32>
    %33 = tpu.concatenate %29, %29, %29, %29, %29, %29 in 1 : vector<14x14xf32>, vector<14x14xf32>, vector<14x14xf32>, vector<14x14xf32>, vector<14x14xf32>, vector<14x14xf32> -> vector<14x84xf32>
    %34 = vector.broadcast %4 : vector<1x84xf32> to vector<14x84xf32>
    %35 = arith.mulf %33, %34 : vector<14x84xf32>
    %36 = arith.addf %32, %35 : vector<14x84xf32>
    %37 = vector.broadcast %5 : vector<1x84xf32> to vector<14x84xf32>
    %38 = arith.addf %36, %37 : vector<14x84xf32>
    %39 = math.tanh %38 : vector<14x84xf32>
    %40 = vector.extract_strided_slice %39 {offsets = [0, 0], sizes = [10, 84], strides = [1, 1]} : vector<14x84xf32> to vector<10x84xf32>
    %41 = vector.extract_strided_slice %39 {offsets = [1, 0], sizes = [10, 84], strides = [1, 1]} : vector<14x84xf32> to vector<10x84xf32>
    %42 = vector.extract_strided_slice %39 {offsets = [2, 0], sizes = [10, 84], strides = [1, 1]} : vector<14x84xf32> to vector<10x84xf32>
    %43 = vector.extract_strided_slice %39 {offsets = [3, 0], sizes = [10, 84], strides = [1, 1]} : vector<14x84xf32> to vector<10x84xf32>
    %44 = vector.extract_strided_slice %39 {offsets = [4, 0], sizes = [10, 84], strides = [1, 1]} : vector<14x84xf32> to vector<10x84xf32>
    %45 = tpu.concatenate %40, %41, %42, %43, %44 in 1 : vector<10x84xf32>, vector<10x84xf32>, vector<10x84xf32>, vector<10x84xf32>, vector<10x84xf32> -> vector<10x420xf32>
    %cst_19 = arith.constant dense<0.000000e+00> : vector<10x160xf32>
    %46 = tpu.matmul %45, %6, %cst_19 {dimension_numbers = #tpu.dot_dimension_numbers<[1], [0], [0], [1], [0, 0, 1, 1], [], []>} : vector<10x420xf32>, vector<420x160xf32>, vector<10x160xf32> -> vector<10x160xf32>
    %47 = vector.broadcast %7 : vector<1x160xf32> to vector<10x160xf32>
    %48 = arith.addf %46, %47 : vector<10x160xf32>
    %49 = vector.extract_strided_slice %48 {offsets = [0, 0], sizes = [10, 159], strides = [1, 1]} : vector<10x160xf32> to vector<10x159xf32>
    %50 = vector.extract_strided_slice %48 {offsets = [0, 1], sizes = [10, 159], strides = [1, 1]} : vector<10x160xf32> to vector<10x159xf32>
    %51 = arith.maximumf %49, %50 : vector<10x159xf32>
    %52 = vector.extract_strided_slice %51 {offsets = [0, 0], sizes = [9, 159], strides = [1, 1]} : vector<10x159xf32> to vector<9x159xf32>
    %53 = vector.extract_strided_slice %51 {offsets = [1, 0], sizes = [9, 159], strides = [1, 1]} : vector<10x159xf32> to vector<9x159xf32>
    %54 = arith.maximumf %52, %53 : vector<9x159xf32>
    %cst_20 = arith.constant dense<0.000000e+00> : vector<5x159xf32>
    %55 = tpu.matmul %2, %54, %cst_20 {dimension_numbers = #tpu.dot_dimension_numbers<[1], [0], [0], [1], [0, 0, 1, 1], [], []>} : vector<5x9xf32>, vector<9x159xf32>, vector<5x159xf32> -> vector<5x159xf32>
    %56 = math.tanh %55 : vector<5x159xf32>
    %57 = vector.extract_strided_slice %56 {offsets = [0, 0], sizes = [1, 159], strides = [1, 1]} : vector<5x159xf32> to vector<1x159xf32>
    %58 = vector.extract_strided_slice %56 {offsets = [1, 0], sizes = [1, 159], strides = [1, 1]} : vector<5x159xf32> to vector<1x159xf32>
    %59 = vector.extract_strided_slice %56 {offsets = [2, 0], sizes = [1, 159], strides = [1, 1]} : vector<5x159xf32> to vector<1x159xf32>
    %60 = vector.extract_strided_slice %56 {offsets = [3, 0], sizes = [1, 159], strides = [1, 1]} : vector<5x159xf32> to vector<1x159xf32>
    %61 = vector.extract_strided_slice %56 {offsets = [4, 0], sizes = [1, 159], strides = [1, 1]} : vector<5x159xf32> to vector<1x159xf32>
    %62 = tpu.concatenate %57, %58, %59, %60, %61 in 1 : vector<1x159xf32>, vector<1x159xf32>, vector<1x159xf32>, vector<1x159xf32>, vector<1x159xf32> -> vector<1x795xf32>
    %63 = arith.index_cast %c0_i32 : i32 to index
    %c0_21 = arith.constant 0 : index
    %64 = vector.load %arg17[%63, %c0_21] : memref<2x795xf32, #tpu.memory_space<vmem>>, vector<1x795xf32>
    tpu.vector_store %arg17[%63, %c0_21], %62 {strides = array<i32>} : memref<2x795xf32, #tpu.memory_space<vmem>>, vector<1x795xf32>,
    %c1_i32 = arith.constant 1 : i32
    %65 = arith.index_cast %c1_i32 : i32 to index
    %c0_22 = arith.constant 0 : index
    %c0_23 = arith.constant 0 : index
    %c0_24 = arith.constant 0 : index
    %66 = vector.load %arg1[%65, %c0_22, %c0_23, %c0_24] : memref<2x1x28x28xf32, #tpu.memory_space<vmem>>, vector<1x1x28x28xf32>
    %67 = vector.shape_cast %66 : vector<1x1x28x28xf32> to vector<1x28x28xf32>
    %68 = vector.shape_cast %67 : vector<1x28x28xf32> to vector<28x28xf32>
    %69 = vector.extract_strided_slice %68 {offsets = [0, 0], sizes = [28, 27], strides = [1, 1]} : vector<28x28xf32> to vector<28x27xf32>
    %70 = vector.extract_strided_slice %68 {offsets = [0, 1], sizes = [28, 27], strides = [1, 1]} : vector<28x28xf32> to vector<28x27xf32>
    %71 = arith.maximumf %69, %70 : vector<28x27xf32>
    %72 = vector.extract_strided_slice %68 {offsets = [0, 0], sizes = [28, 27], strides = [1, 1]} : vector<28x28xf32> to vector<28x27xf32>
    %73 = vector.extract_strided_slice %68 {offsets = [0, 1], sizes = [28, 27], strides = [1, 1]} : vector<28x28xf32> to vector<28x27xf32>
    %74 = arith.minimumf %72, %73 : vector<28x27xf32>
    %75 = tpu.concatenate %71, %74 in 1 : vector<28x27xf32>, vector<28x27xf32> -> vector<28x54xf32>
    %cst_25 = arith.constant dense<0.000000e+00> : vector<28x28xf32>
    %76 = tpu.matmul %75, %0, %cst_25 {dimension_numbers = #tpu.dot_dimension_numbers<[1], [0], [0], [1], [0, 0, 1, 1], [], []>} : vector<28x54xf32>, vector<54x28xf32>, vector<28x28xf32> -> vector<28x28xf32>
    %77 = vector.extract_strided_slice %76 {offsets = [0, 0], sizes = [27, 28], strides = [1, 1]} : vector<28x28xf32> to vector<27x28xf32>
    %78 = vector.extract_strided_slice %76 {offsets = [1, 0], sizes = [27, 28], strides = [1, 1]} : vector<28x28xf32> to vector<27x28xf32>
    %79 = arith.maximumf %77, %78 : vector<27x28xf32>
    %80 = vector.extract_strided_slice %79 {offsets = [0, 0], sizes = [27, 14], strides = [1, 1]} : vector<27x28xf32> to vector<27x14xf32>
    %81 = arith.minimumf %77, %78 : vector<27x28xf32>
    %82 = vector.extract_strided_slice %81 {offsets = [0, 14], sizes = [27, 14], strides = [1, 1]} : vector<27x28xf32> to vector<27x14xf32>
    %83 = tpu.concatenate %80, %82 in 1 : vector<27x14xf32>, vector<27x14xf32> -> vector<27x28xf32>
    %cst_26 = arith.constant dense<0.000000e+00> : vector<14x28xf32>
    %84 = tpu.matmul %1, %83, %cst_26 {dimension_numbers = #tpu.dot_dimension_numbers<[1], [0], [0], [1], [0, 0, 1, 1], [], []>} : vector<14x27xf32>, vector<27x28xf32>, vector<14x28xf32> -> vector<14x28xf32>
    %85 = vector.extract_strided_slice %84 {offsets = [0, 0], sizes = [14, 14], strides = [1, 1]} : vector<14x28xf32> to vector<14x14xf32>
    %86 = vector.extract_strided_slice %84 {offsets = [0, 14], sizes = [14, 14], strides = [1, 1]} : vector<14x28xf32> to vector<14x14xf32>
    %87 = tpu.concatenate %85, %85, %85, %85, %85, %85 in 1 : vector<14x14xf32>, vector<14x14xf32>, vector<14x14xf32>, vector<14x14xf32>, vector<14x14xf32>, vector<14x14xf32> -> vector<14x84xf32>
    %88 = vector.broadcast %3 : vector<1x84xf32> to vector<14x84xf32>
    %89 = arith.mulf %87, %88 : vector<14x84xf32>
    %90 = tpu.concatenate %86, %86, %86, %86, %86, %86 in 1 : vector<14x14xf32>, vector<14x14xf32>, vector<14x14xf32>, vector<14x14xf32>, vector<14x14xf32>, vector<14x14xf32> -> vector<14x84xf32>
    %91 = vector.broadcast %4 : vector<1x84xf32> to vector<14x84xf32>
    %92 = arith.mulf %90, %91 : vector<14x84xf32>
    %93 = arith.addf %89, %92 : vector<14x84xf32>
    %94 = vector.broadcast %5 : vector<1x84xf32> to vector<14x84xf32>
    %95 = arith.addf %93, %94 : vector<14x84xf32>
    %96 = math.tanh %95 : vector<14x84xf32>
    %97 = vector.extract_strided_slice %96 {offsets = [0, 0], sizes = [10, 84], strides = [1, 1]} : vector<14x84xf32> to vector<10x84xf32>
    %98 = vector.extract_strided_slice %96 {offsets = [1, 0], sizes = [10, 84], strides = [1, 1]} : vector<14x84xf32> to vector<10x84xf32>
    %99 = vector.extract_strided_slice %96 {offsets = [2, 0], sizes = [10, 84], strides = [1, 1]} : vector<14x84xf32> to vector<10x84xf32>
    %100 = vector.extract_strided_slice %96 {offsets = [3, 0], sizes = [10, 84], strides = [1, 1]} : vector<14x84xf32> to vector<10x84xf32>
    %101 = vector.extract_strided_slice %96 {offsets = [4, 0], sizes = [10, 84], strides = [1, 1]} : vector<14x84xf32> to vector<10x84xf32>
    %102 = tpu.concatenate %97, %98, %99, %100, %101 in 1 : vector<10x84xf32>, vector<10x84xf32>, vector<10x84xf32>, vector<10x84xf32>, vector<10x84xf32> -> vector<10x420xf32>
    %cst_27 = arith.constant dense<0.000000e+00> : vector<10x160xf32>
    %103 = tpu.matmul %102, %6, %cst_27 {dimension_numbers = #tpu.dot_dimension_numbers<[1], [0], [0], [1], [0, 0, 1, 1], [], []>} : vector<10x420xf32>, vector<420x160xf32>, vector<10x160xf32> -> vector<10x160xf32>
    %104 = vector.broadcast %7 : vector<1x160xf32> to vector<10x160xf32>
    %105 = arith.addf %103, %104 : vector<10x160xf32>
    %106 = vector.extract_strided_slice %105 {offsets = [0, 0], sizes = [10, 159], strides = [1, 1]} : vector<10x160xf32> to vector<10x159xf32>
    %107 = vector.extract_strided_slice %105 {offsets = [0, 1], sizes = [10, 159], strides = [1, 1]} : vector<10x160xf32> to vector<10x159xf32>
    %108 = arith.maximumf %106, %107 : vector<10x159xf32>
    %109 = vector.extract_strided_slice %108 {offsets = [0, 0], sizes = [9, 159], strides = [1, 1]} : vector<10x159xf32> to vector<9x159xf32>
    %110 = vector.extract_strided_slice %108 {offsets = [1, 0], sizes = [9, 159], strides = [1, 1]} : vector<10x159xf32> to vector<9x159xf32>
    %111 = arith.maximumf %109, %110 : vector<9x159xf32>
    %cst_28 = arith.constant dense<0.000000e+00> : vector<5x159xf32>
    %112 = tpu.matmul %2, %111, %cst_28 {dimension_numbers = #tpu.dot_dimension_numbers<[1], [0], [0], [1], [0, 0, 1, 1], [], []>} : vector<5x9xf32>, vector<9x159xf32>, vector<5x159xf32> -> vector<5x159xf32>
    %113 = math.tanh %112 : vector<5x159xf32>
    %114 = vector.extract_strided_slice %113 {offsets = [0, 0], sizes = [1, 159], strides = [1, 1]} : vector<5x159xf32> to vector<1x159xf32>
    %115 = vector.extract_strided_slice %113 {offsets = [1, 0], sizes = [1, 159], strides = [1, 1]} : vector<5x159xf32> to vector<1x159xf32>
    %116 = vector.extract_strided_slice %113 {offsets = [2, 0], sizes = [1, 159], strides = [1, 1]} : vector<5x159xf32> to vector<1x159xf32>
    %117 = vector.extract_strided_slice %113 {offsets = [3, 0], sizes = [1, 159], strides = [1, 1]} : vector<5x159xf32> to vector<1x159xf32>
    %118 = vector.extract_strided_slice %113 {offsets = [4, 0], sizes = [1, 159], strides = [1, 1]} : vector<5x159xf32> to vector<1x159xf32>
    %119 = tpu.concatenate %114, %115, %116, %117, %118 in 1 : vector<1x159xf32>, vector<1x159xf32>, vector<1x159xf32>, vector<1x159xf32>, vector<1x159xf32> -> vector<1x795xf32>
    %120 = arith.index_cast %c1_i32 : i32 to index
    %c0_29 = arith.constant 0 : index
    %121 = vector.load %arg17[%120, %c0_29] : memref<2x795xf32, #tpu.memory_space<vmem>>, vector<1x795xf32>
    tpu.vector_store %arg17[%120, %c0_29], %119 {strides = array<i32>} : memref<2x795xf32, #tpu.memory_space<vmem>>, vector<1x795xf32>,
    %c2_i32 = arith.constant 2 : i32
    %c0_30 = arith.constant 0 : index
    %c0_31 = arith.constant 0 : index
    %122 = vector.load %arg17[%c0_30, %c0_31] : memref<2x795xf32, #tpu.memory_space<vmem>>, vector<2x795xf32>
    %c0_32 = arith.constant 0 : index
    %c0_33 = arith.constant 0 : index
    %123 = vector.load %arg10[%c0_32, %c0_33] : memref<795x120xf32, #tpu.memory_space<vmem>>, vector<795x120xf32>
    %cst_34 = arith.constant dense<0.000000e+00> : vector<2x120xf32>
    %124 = tpu.matmul %122, %123, %cst_34 {dimension_numbers = #tpu.dot_dimension_numbers<[1], [0], [0], [1], [0, 0, 1, 1], [], []>} : vector<2x795xf32>, vector<795x120xf32>, vector<2x120xf32> -> vector<2x120xf32>
    %c0_35 = arith.constant 0 : index
    %c0_36 = arith.constant 0 : index
    %125 = vector.load %arg11[%c0_35, %c0_36] : memref<1x120xf32, #tpu.memory_space<vmem>>, vector<1x120xf32>
    %126 = vector.broadcast %125 : vector<1x120xf32> to vector<2x120xf32>
    %127 = arith.addf %124, %126 : vector<2x120xf32>
    %128 = math.tanh %127 : vector<2x120xf32>
    %c0_37 = arith.constant 0 : index
    %c0_38 = arith.constant 0 : index
    %129 = vector.load %arg12[%c0_37, %c0_38] : memref<120x84xf32, #tpu.memory_space<vmem>>, vector<120x84xf32>
    %cst_39 = arith.constant dense<0.000000e+00> : vector<2x84xf32>
    %130 = tpu.matmul %128, %129, %cst_39 {dimension_numbers = #tpu.dot_dimension_numbers<[1], [0], [0], [1], [0, 0, 1, 1], [], []>} : vector<2x120xf32>, vector<120x84xf32>, vector<2x84xf32> -> vector<2x84xf32>
    %c0_40 = arith.constant 0 : index
    %c0_41 = arith.constant 0 : index
    %131 = vector.load %arg13[%c0_40, %c0_41] : memref<1x84xf32, #tpu.memory_space<vmem>>, vector<1x84xf32>
    %132 = vector.broadcast %131 : vector<1x84xf32> to vector<2x84xf32>
    %133 = arith.addf %130, %132 : vector<2x84xf32>
    %134 = math.tanh %133 : vector<2x84xf32>
    %c0_42 = arith.constant 0 : index
    %c0_43 = arith.constant 0 : index
    %135 = vector.load %arg14[%c0_42, %c0_43] : memref<84x128xf32, #tpu.memory_space<vmem>>, vector<84x128xf32>
    %cst_44 = arith.constant dense<0.000000e+00> : vector<2x128xf32>
    %136 = tpu.matmul %134, %135, %cst_44 {dimension_numbers = #tpu.dot_dimension_numbers<[1], [0], [0], [1], [0, 0, 1, 1], [], []>} : vector<2x84xf32>, vector<84x128xf32>, vector<2x128xf32> -> vector<2x128xf32>
    %c0_45 = arith.constant 0 : index
    %c0_46 = arith.constant 0 : index
    %137 = vector.load %arg15[%c0_45, %c0_46] : memref<1x128xf32, #tpu.memory_space<vmem>>, vector<1x128xf32>
    %138 = vector.broadcast %137 : vector<1x128xf32> to vector<2x128xf32>
    %139 = arith.addf %136, %138 : vector<2x128xf32>
    %cst_47 = arith.constant dense<0xFF800000> : vector<2xf32>
    %140 = vector.multi_reduction <maximumf>, %139, %cst_47 [1] : vector<2x128xf32> to vector<2xf32>
    %141 = vector.shape_cast %140 : vector<2xf32> to vector<2x1xf32>
    %142 = vector.broadcast %141 : vector<2x1xf32> to vector<2x128xf32>
    %143 = arith.subf %139, %142 : vector<2x128xf32>
    %144 = math.exp %143 : vector<2x128xf32>
    %cst_48 = arith.constant dense<0.000000e+00> : vector<2xf32>
    %145 = vector.multi_reduction <add>, %144, %cst_48 [1] : vector<2x128xf32> to vector<2xf32>
    %146 = vector.shape_cast %145 : vector<2xf32> to vector<2x1xf32>
    %147 = tpu.reciprocal %146 {approx = true} : vector<2x1xf32> -> vector<2x1xf32>
    %148 = vector.broadcast %147 : vector<2x1xf32> to vector<2x128xf32>
    %149 = arith.mulf %144, %148 : vector<2x128xf32>
    %c0_49 = arith.constant 0 : index
    %c0_50 = arith.constant 0 : index
    %150 = vector.load %arg16[%c0_49, %c0_50] : memref<2x128xf32, #tpu.memory_space<vmem>>, vector<2x128xf32>
    tpu.vector_store %arg16[%c0_49, %c0_50], %149 {strides = array<i32>} : memref<2x128xf32, #tpu.memory_space<vmem>>, vector<2x128xf32>,
    return
  }
  func.func @transform_0(%arg0: i32) -> (i32, i32, i32, i32) {
    %c0_i32 = arith.constant 0 : i32
    %c0_i32_0 = arith.constant 0 : i32
    %c0_i32_1 = arith.constant 0 : i32
    %c0_i32_2 = arith.constant 0 : i32
    return %arg0, %c0_i32, %c0_i32_0, %c0_i32_1 : i32, i32, i32, i32
  }
  func.func @transform_1(%arg0: i32) -> (i32, i32) {
    %c0_i32 = arith.constant 0 : i32
    %c0_i32_0 = arith.constant 0 : i32
    %c0_i32_1 = arith.constant 0 : i32
    return %c0_i32, %c0_i32_0 : i32, i32
  }
  func.func @transform_2(%arg0: i32) -> (i32, i32) {
    %c0_i32 = arith.constant 0 : i32
    %c0_i32_0 = arith.constant 0 : i32
    %c0_i32_1 = arith.constant 0 : i32
    return %c0_i32, %c0_i32_0 : i32, i32
  }
  func.func @transform_3(%arg0: i32) -> (i32, i32) {
    %c0_i32 = arith.constant 0 : i32
    %c0_i32_0 = arith.constant 0 : i32
    %c0_i32_1 = arith.constant 0 : i32
    return %c0_i32, %c0_i32_0 : i32, i32
  }
  func.func @transform_4(%arg0: i32) -> (i32, i32) {
    %c0_i32 = arith.constant 0 : i32
    %c0_i32_0 = arith.constant 0 : i32
    %c0_i32_1 = arith.constant 0 : i32
    return %c0_i32, %c0_i32_0 : i32, i32
  }
  func.func @transform_5(%arg0: i32) -> (i32, i32) {
    %c0_i32 = arith.constant 0 : i32
    %c0_i32_0 = arith.constant 0 : i32
    %c0_i32_1 = arith.constant 0 : i32
    return %c0_i32, %c0_i32_0 : i32, i32
  }
  func.func @transform_6(%arg0: i32) -> (i32, i32) {
    %c0_i32 = arith.constant 0 : i32
    %c0_i32_0 = arith.constant 0 : i32
    %c0_i32_1 = arith.constant 0 : i32
    return %c0_i32, %c0_i32_0 : i32, i32
  }
  func.func @transform_7(%arg0: i32) -> (i32, i32) {
    %c0_i32 = arith.constant 0 : i32
    %c0_i32_0 = arith.constant 0 : i32
    %c0_i32_1 = arith.constant 0 : i32
    return %c0_i32, %c0_i32_0 : i32, i32
  }
  func.func @transform_8(%arg0: i32) -> (i32, i32) {
    %c0_i32 = arith.constant 0 : i32
    %c0_i32_0 = arith.constant 0 : i32
    %c0_i32_1 = arith.constant 0 : i32
    return %c0_i32, %c0_i32_0 : i32, i32
  }
  func.func @transform_9(%arg0: i32) -> (i32, i32) {
    %c0_i32 = arith.constant 0 : i32
    %c0_i32_0 = arith.constant 0 : i32
    %c0_i32_1 = arith.constant 0 : i32
    return %c0_i32, %c0_i32_0 : i32, i32
  }
  func.func @transform_10(%arg0: i32) -> (i32, i32) {
    %c0_i32 = arith.constant 0 : i32
    %c0_i32_0 = arith.constant 0 : i32
    %c0_i32_1 = arith.constant 0 : i32
    return %c0_i32, %c0_i32_0 : i32, i32
  }
  func.func @transform_11(%arg0: i32) -> (i32, i32) {
    %c0_i32 = arith.constant 0 : i32
    %c0_i32_0 = arith.constant 0 : i32
    %c0_i32_1 = arith.constant 0 : i32
    return %c0_i32, %c0_i32_0 : i32, i32
  }
  func.func @transform_12(%arg0: i32) -> (i32, i32) {
    %c0_i32 = arith.constant 0 : i32
    %c0_i32_0 = arith.constant 0 : i32
    %c0_i32_1 = arith.constant 0 : i32
    return %c0_i32, %c0_i32_0 : i32, i32
  }
  func.func @transform_13(%arg0: i32) -> (i32, i32) {
    %c0_i32 = arith.constant 0 : i32
    %c0_i32_0 = arith.constant 0 : i32
    %c0_i32_1 = arith.constant 0 : i32
    return %c0_i32, %c0_i32_0 : i32, i32
  }
  func.func @transform_14(%arg0: i32) -> (i32, i32) {
    %c0_i32 = arith.constant 0 : i32
    %c0_i32_0 = arith.constant 0 : i32
    %c0_i32_1 = arith.constant 0 : i32
    return %c0_i32, %c0_i32_0 : i32, i32
  }
  func.func @transform_15(%arg0: i32) -> (i32, i32) {
    %c0_i32 = arith.constant 0 : i32
    %c0_i32_0 = arith.constant 0 : i32
    return %arg0, %c0_i32 : i32, i32
  }
}

</mosaic_0001>

<bundles_post_ra>
// kernel: lenet5_forward.1
= control target key start
LH: loop header
LB: loop body
LE: loop exit
PB: predicated region body
PF: predicated region fallthrough
CT: control target
= control target key end

     0   :  { %vm233_vm0 = vcmask 1045504   ;;  %s2816_s22 = smov 127   ;;  %s4572_s0 = inlined_call_operand.vmem [shape: f32[2,1,28,28], index: 0, kind: input, shape index: {}]   ;;  %s4573_s1 = inlined_call_operand.vmem [shape: f32[54,28], index: 1, kind: input, shape index: {}]   ;;  %s4574_s2 = inlined_call_operand.vmem [shape: f32[14,27], index: 2, kind: input, shape index: {}]   ;;  %s4575_s3 = inlined_call_operand.vmem [shape: f32[5,9], index: 3, kind: input, shape index: {}]   ;;  %s4576_s4 = inlined_call_operand.vmem [shape: f32[1,84], index: 4, kind: input, shape index: {}]   ;;  %s4577_s5 = inlined_call_operand.vmem [shape: f32[1,84], index: 5, kind: input, shape index: {}]   ;;  %s4578_s6 = inlined_call_operand.vmem [shape: f32[1,84], index: 6, kind: input, shape index: {}]   ;;  %s4579_s7 = inlined_call_operand.vmem [shape: f32[420,160], index: 7, kind: input, shape index: {}]   ;;  %s4580_s8 = inlined_call_operand.vmem [shape: f32[1,160], index: 8, kind: input, shape index: {}]   ;;  %s4581_s9 = inlined_call_operand.vmem [shape: f32[795,120], index: 9, kind: input, shape index: {}]   ;;  %s4582_s10 = inlined_call_operand.vmem [shape: f32[1,120], index: 10, kind: input, shape index: {}]   ;;  %s4583_s11 = inlined_call_operand.vmem [shape: f32[120,84], index: 11, kind: input, shape index: {}]   ;;  %s4584_s12 = inlined_call_operand.vmem [shape: f32[1,84], index: 12, kind: input, shape index: {}]   ;;  %s4585_s13 = inlined_call_operand.vmem [shape: f32[84,128], index: 13, kind: input, shape index: {}]   ;;  %s4586_s14 = inlined_call_operand.vmem [shape: f32[1,128], index: 14, kind: input, shape index: {}]   ;;  %s4587_s15 = inlined_call_operand.hbm [shape: f32[2,128], index: 15, kind: output, shape index: {}]  }
   0x1   :  { %v171_v0 = vld [vmem:[%s4572_s0] sm:$0xff]  ;;  %v173_v1 = vld [vmem:[%s4572_s0 + $0x10] sm:$0xff]  ;;  %v172_v3 = vld [vmem:[%s4572_s0 + $0x8] sm:$0xff] }
   0x2   :  { %179 = vrot.lane.b32.xlu0 %v171_v0, %s2816_s22  ;;  %183 = vrot.lane.b32.xlu1 %v173_v1, %s2816_s22  ;;  %v57_v2 = vld [vmem:[%s4573_s1 + $0x30] sm:$0x3f]  ;;  %v174_v4 = vld [vmem:[%s4572_s0 + $0x18] sm:$0xf] }
   0x3   :  { %2590 = vmatprep.subr.msk.mxu0 %vm233_vm0, %v57_v2  ;;  %v56_v5 = vld [vmem:[%s4573_s1 + $0x28] sm:$0xff] }
   0x4   :  { %2591 = vmatpush3.msk.msra.mxu0 %vm233_vm0, %v57_v2 }
   0x5   :  { %20 = vsyncpa [#allocation4], 0  ;;  %2592 = vmatprep.subr.mxu0 %v56_v5  ;;  %v55_v6 = vld [vmem:[%s4573_s1 + $0x20] sm:$0xff]  ;;  %v54_v7 = vld [vmem:[%s4573_s1 + $0x18] sm:$0xff]  ;;  %s2817_s27 = smov 27   ;;  %vm215_vm1 = vcmask 220160  }
   0x6   :  { %181 = vrot.lane.b32.xlu0 %v172_v3, %s2816_s22  ;;  %185 = vrot.lane.b32.xlu1 %v174_v4, %s2816_s22  ;;  %v2949_v8 = vld [vmem:[%s4573_s1 + $0x10] sm:$0xff]  ;;  %v2955_v9 = vld [vmem:[%s4573_s1 + $0x8] sm:$0xff]  ;;  %vm220_vm2 = vcmask 441344   ;;  %vm326_vm3 = vcmask 1046528   ;;  %vm346_vm4 = vcmask 113664   ;;  %vm357_vm5 = vcmask 1042432  }
   0x7   :  { %2593 = vmatpush3.msra.mxu0 %v56_v5  ;;  %v2963_v10 = vld [vmem:[%s4573_s1] sm:$0xff]  ;;  %v59_v55 = vld [vmem:[%s4574_s2 + $0x8] sm:$0x3f]  ;;  %s2818_s17 = smov 14   ;;  %s2819_s18 = smov 114   ;;  %v3030_v58 = vld [vmem:[%s4579_s7 + $0xf8] sm:$0xff] }
   0x8   :  { %2594 = vmatprep.subr.mxu0 %v55_v6  ;;  %v2982_v31 = vld [vmem:[%s4574_s2] sm:$0xff]  ;;  %s2820_s19 = smov 28   ;;  %s2821_s20 = smov 42   ;;  %v3035_v59 = vld [vmem:[%s4579_s7 + $0xf0] sm:$0xff]  ;;  %v3040_v60 = vld [vmem:[%s4579_s7 + $0xe8] sm:$0xff]  ;;  %vm556_vm6 = vcmask 1043456  }
   0x9   :  { %2595 = vmatpush3.msra.mxu0 %v55_v6  ;;  %2618 = vmatprep.mubr.msk.f32.mxu1 %vm215_vm1, %v2982_v31  ;;  %s4588_s21 = smov 56   ;;  %s2823_s23 = smov 70   ;;  %v3046_v61 = vld [vmem:[%s4579_s7 + $0xe0] sm:$0xff]  ;;  %v3052_v62 = vld [vmem:[%s4579_s7 + $0xd8] sm:$0xff]  ;;  %v3058_v63 = vld [vmem:[%s4579_s7 + $0xd0] sm:$0xff]  ;;  %vm470_vm7 = vcmask 228352  }
   0xa   :  { %2596 = vmatprep.subr.mxu0 %v54_v7  ;;  %v3076_v2 = vld [vmem:[%s4579_s7 + $0xb8] sm:$0xff]  ;;  %v3093_v5 = vld [vmem:[%s4579_s7 + $0xa8] sm:$0xff]  ;;  %v3099_v6 = vld [vmem:[%s4579_s7 + $0x2f0] sm:$0xff]  ;;  %vm473_vm8 = vcmask 343040   ;;  %vm476_vm9 = vcmask 457728   ;;  %vm479_vm10 = vcmask 572416  }
   0xb   :  { %2597 = vmatpush3.msra.mxu0 %v54_v7  ;;  %4683 = vst [vmem:[#allocation7_spill] sm:$0xff] %v3099_v6  ;;  %v3104_v7 = vld [vmem:[%s4579_s7 + $0x2e8] sm:$0xff]  ;;  %s2825_s26 = smov 84   ;;  %vm4657_vm11 = vcmask 1044480   ;;  %s2826_s28 = smov 80   ;;  %vm569_vm12 = vcmask 326656  }
   0xc   :  { %2598 = vmatprep.subr.mxu0 %v2949_v8  ;;  %4684 = vst [vmem:[#allocation8_spill] sm:$0xff] %v3104_v7  ;;  %vm575_vm13 = vcmask 654336   ;;  %vm589_vm14 = vcmask 293888   ;;  %vm4675_vm15 = vcmask 1014784  }
   0xd   :  { %2599 = vmatpush3.msra.mxu0 %v2949_v8 }
   0xe   :  { %2600 = vmatprep.subr.mxu0 %v2955_v9 }
   0xf   :  { %2601 = vmatpush3.msra.mxu0 %v2955_v9 }
  0x10   :  { %2602 = vmatprep.subr.mxu0 %v2963_v10 }
  0x11   :  { %2603 = vmatpush3.msra.mxu0 %v2963_v10 }
  0x74   :  { %v180_v11 = vpop.permute.xlu0 %179  ;;  %v184_v12 = vpop.permute.xlu1 %183 }
  0x75   :  { %v195_v13 = vmin.f32 %v171_v0, %v180_v11  ;;  %v197_v14 = vmin.f32 %v173_v1, %v184_v12  ;;  %v191_v19 = vmax.f32 %v171_v0, %v180_v11  ;;  %v193_v22 = vmax.f32 %v173_v1, %v184_v12  ;;  %v3064_v0 = vld [vmem:[%s4579_s7 + $0xc8] sm:$0xff]  ;;  %v3070_v1 = vld [vmem:[%s4579_s7 + $0xc0] sm:$0xff] }
  0x76   :  { %v3110_v11 = vld [vmem:[%s4579_s7 + $0xa0] sm:$0xff] }
  0x77   :  { %203 = vrot.lane.b32.xlu0 %v195_v13, %s2817_s27  ;;  %v3116_v12 = vld [vmem:[%s4579_s7 + $0x2e0] sm:$0xff]  ;;  %v3122_v13 = vld [vmem:[%s4579_s7 + $0x98] sm:$0xff] }
  0x78   :  { %v182_v15 = vpop.permute.xlu0 %181  ;;  %v186_v16 = vpop.permute.xlu1 %185  ;;  %4685 = vst [vmem:[#allocation9_spill] sm:$0xff] %v3116_v12 }
  0x79   :  { %v196_v17 = vmin.f32 %v172_v3, %v182_v15  ;;  %v198_v18 = vmin.f32 %v174_v4, %v186_v16  ;;  %v192_v23 = vmax.f32 %v172_v3, %v182_v15  ;;  %v194_v28 = vmax.f32 %v174_v4, %v186_v16  ;;  %v3082_v3 = vld [vmem:[%s4579_s7 + $0xb0] sm:$0xff]  ;;  %v3087_v4 = vld [vmem:[%s4579_s7 + $0x2f8] sm:$0xff] }
  0x7a   :  { %4682 = vst [vmem:[#allocation6_spill] sm:$0xff] %v3087_v4  ;;  %677 = vmatprep.subr.mxu0 %v3087_v4  ;;  %v3133_v15 = vld [vmem:[%s4579_s7 + $0x2d0] sm:$0xff] }
  0x7b   :  { %207 = vrot.lane.b32.xlu0 %v197_v14, %s2817_s27  ;;  %205 = vrot.lane.b32.xlu1 %v196_v17, %s2817_s27  ;;  %v3128_v14 = vld [vmem:[%s4579_s7 + $0x2d8] sm:$0xff]  ;;  %4687 = vst [vmem:[#allocation11_spill] sm:$0xff] %v3133_v15  ;;  %v3139_v16 = vld [vmem:[%s4579_s7 + $0x90] sm:$0xff] }
  0x7c   :  { %4686 = vst [vmem:[#allocation10_spill] sm:$0xff] %v3128_v14  ;;  %v3145_v17 = vld [vmem:[%s4579_s7 + $0x2c8] sm:$0xff]  ;;  %v3594_v4 = vld [vmem:[%s4579_s7 + $0x130] sm:$0xff] }
  0x7d   :  { %4688 = vst [vmem:[#allocation12_spill] sm:$0xff] %v3145_v17  ;;  %4743 = vst [vmem:[#allocation67_spill] sm:$0xff] %v3594_v4 }
  0x7f   :  { %209 = vrot.lane.b32.xlu1 %v198_v18, %s2817_s27  ;;  %v3151_v18 = vld [vmem:[%s4579_s7 + $0x88] sm:$0xff] }
  0xe9   :  { %v204_v20 = vpop.permute.xlu0 %203 }
  0xea   :  { %v216_v21 = vsel %vm215_vm1, %v191_v19, %v204_v20  ;;  %v3157_v19 = vld [vmem:[%s4579_s7 + $0x2c0] sm:$0xff] }
  0xeb   :  { %2604 = vmatprep.mubr.msk.f32.mxu0 %vm220_vm2, %v216_v21  ;;  %4689 = vst [vmem:[#allocation13_spill] sm:$0xff] %v3157_v19  ;;  %v3163_v20 = vld [vmem:[%s4579_s7 + $0x80] sm:$0xff]  ;;  %v3169_v21 = vld [vmem:[%s4579_s7 + $0x2b8] sm:$0xff] }
  0xec   :  { %4690 = vst [vmem:[#allocation14_spill] sm:$0xff] %v3169_v21 }
  0xed   :  { %v206_v24 = vpop.permute.xlu1 %205  ;;  %v208_v25 = vpop.permute.xlu0 %207 }
  0xee   :  { %v217_v26 = vsel %vm215_vm1, %v192_v23, %v206_v24  ;;  %v218_v27 = vsel %vm215_vm1, %v193_v22, %v208_v25  ;;  %v3175_v22 = vld [vmem:[%s4579_s7 + $0x78] sm:$0xff]  ;;  %v3181_v23 = vld [vmem:[%s4579_s7 + $0x2b0] sm:$0xff]  ;;  %v3193_v25 = vld [vmem:[%s4579_s7 + $0x2a8] sm:$0xff] }
  0xef   :  { %2605 = vmatmul.mubr.msk.f32.vlgmr.msra.gmra.mxu0 %vm220_vm2, %v217_v26  ;;  %4691 = vst [vmem:[#allocation15_spill] sm:$0xff] %v3181_v23  ;;  %v3187_v24 = vld [vmem:[%s4579_s7 + $0x70] sm:$0xff]  ;;  %4692 = vst [vmem:[#allocation16_spill] sm:$0xff] %v3193_v25  ;;  %v3199_v26 = vld [vmem:[%s4579_s7 + $0x68] sm:$0xff] }
  0xf0   :  { %2607 = vmatprep.mubr.msk.f32.mxu0 %vm220_vm2, %v218_v27  ;;  %678 = vmatpush1.msra.mxu0 %v3099_v6  ;;  %v3205_v27 = vld [vmem:[%s4579_s7 + $0x2a0] sm:$0xff]  ;;  %v3588_v6 = vld [vmem:[%s4579_s7 + $0x138] sm:$0xff] }
  0xf1   :  { %v210_v29 = vpop.permute.xlu1 %209  ;;  %679 = vmatprep.subr.mxu0 %v3104_v7  ;;  %4693 = vst [vmem:[#allocation17_spill] sm:$0xff] %v3205_v27  ;;  %v3582_v7 = vld [vmem:[%s4579_s7 + $0x140] sm:$0xff]  ;;  %4742 = vst [vmem:[#allocation66_spill] sm:$0xff] %v3588_v6 }
  0xf2   :  { %v219_v30 = vsel %vm215_vm1, %v194_v28, %v210_v29  ;;  %680 = vmatpush1.msra.mxu0 %v3116_v12  ;;  %v3211_v28 = vld [vmem:[%s4579_s7 + $0x60] sm:$0xff]  ;;  %v3217_v29 = vld [vmem:[%s4579_s7 + $0x298] sm:$0xff]  ;;  %v3576_v12 = vld [vmem:[%s4579_s7 + $0x148] sm:$0xff]  ;;  %4741 = vst [vmem:[#allocation65_spill] sm:$0xff] %v3582_v7 }
  0xf3   :  { %2608 = vmatmul.mubr.msk.f32.gmra.mxu0 %vm220_vm2, %v219_v30  ;;  %681 = vmatprep.subr.mxu0 %v3128_v14  ;;  %4694 = vst [vmem:[#allocation18_spill] sm:$0xff] %v3217_v29  ;;  %v3223_v30 = vld [vmem:[%s4579_s7 + $0x58] sm:$0xff]  ;;  %v3570_v14 = vld [vmem:[%s4579_s7 + $0x150] sm:$0xff]  ;;  %4740 = vst [vmem:[#allocation64_spill] sm:$0xff] %v3576_v12 }
  0xf4   :  { %682 = vmatpush1.msra.mxu0 %v3133_v15  ;;  %v3564_v15 = vld [vmem:[%s4579_s7 + $0x158] sm:$0xff]  ;;  %4739 = vst [vmem:[#allocation63_spill] sm:$0xff] %v3570_v14 }
  0xf5   :  { %683 = vmatprep.subr.mxu0 %v3145_v17  ;;  %v3558_v17 = vld [vmem:[%s4579_s7 + $0x160] sm:$0xff]  ;;  %4738 = vst [vmem:[#allocation62_spill] sm:$0xff] %v3564_v15 }
  0xf6   :  { %684 = vmatpush1.msra.mxu0 %v3157_v19  ;;  %v3552_v19 = vld [vmem:[%s4579_s7 + $0x168] sm:$0xff]  ;;  %4737 = vst [vmem:[#allocation61_spill] sm:$0xff] %v3558_v17 }
  0xf7   :  { %685 = vmatprep.subr.mxu0 %v3169_v21  ;;  %v3527_v21 = vld [vmem:[%s4579_s7 + $0x188] sm:$0xff]  ;;  %4736 = vst [vmem:[#allocation60_spill] sm:$0xff] %v3552_v19 }
  0xf8   :  { %686 = vmatpush1.msra.mxu0 %v3181_v23  ;;  %v3507_v23 = vld [vmem:[%s4579_s7 + $0x328] sm:$0xff]  ;;  %4732 = vst [vmem:[#allocation56_spill] sm:$0xff] %v3527_v21 }
  0xf9   :  { %687 = vmatprep.subr.mxu0 %v3193_v25  ;;  %v3494_v25 = vld [vmem:[%s4579_s7 + $0x330] sm:$0xff]  ;;  %4729 = vst [vmem:[#allocation53_spill] sm:$0xff] %v3507_v23 }
  0xfa   :  { %688 = vmatpush1.msra.mxu0 %v3205_v27  ;;  %v3481_v27 = vld [vmem:[%s4579_s7 + $0x338] sm:$0xff]  ;;  %4727 = vst [vmem:[#allocation51_spill] sm:$0xff] %v3494_v25 }
  0xfb   :  { %689 = vmatprep.subr.mxu0 %v3217_v29  ;;  %v3469_v29 = vld [vmem:[%s4579_s7 + $0x340] sm:$0xf]  ;;  %4725 = vst [vmem:[#allocation49_spill] sm:$0xff] %v3481_v27 }
  0xfc   :  { %4723 = vst [vmem:[#allocation47_spill] sm:$0xff] %v3469_v29 }
 0x1af   :  { %v2606_v32 = vpop.f32.mrf.mxu0 }
 0x1b0   :  { %v328_v38 = vrot.slane %v2606_v32, 1 }
 0x1b1   :  { %v303_v33 = vpop.f32.mrf.mxu0 }
 0x1b2   :  { %v327_v35 = vrot.slane %v303_v33, 1 }
 0x1b3   :  { %v2609_v34 = vpop.f32.mrf.mxu0 }
 0x1b4   :  { %v332_v36 = vrot.slane %v2609_v34, 1  ;;  %v329_v42 = vsel %vm326_vm3, %v327_v35, %v328_v38  ;;  %v3247_v35 = vld [vmem:[%s4579_s7 + $0x48] sm:$0xff] }
 0x1b5   :  { %v313_v37 = vpop.f32.mrf.mxu0  ;;  %v338_v50 = vmax.f32 %v303_v33, %v329_v42  ;;  %v342_v51 = vmin.f32 %v303_v33, %v329_v42  ;;  %v3235_v33 = vld [vmem:[%s4579_s7 + $0x50] sm:$0xff]  ;;  %v3289_v42 = vld [vmem:[%s4579_s7 + $0x268] sm:$0xff] }
 0x1b6   :  { %v341_v39 = vmax.f32 %v2609_v34, %v332_v36  ;;  %v345_v40 = vmin.f32 %v2609_v34, %v332_v36  ;;  %v330_v41 = vrot.slane %v313_v37, 1  ;;  %v3241_v34 = vld [vmem:[%s4579_s7 + $0x288] sm:$0xff]  ;;  %4700 = vst [vmem:[#allocation24_spill] sm:$0xff] %v3289_v42 }
 0x1b7   :  { %v347_v54 = vsel %vm346_vm4, %v338_v50, %v342_v51  ;;  %4696 = vst [vmem:[#allocation20_spill] sm:$0xff] %v3241_v34  ;;  %v3337_v50 = vld [vmem:[%s4579_s7 + $0x248] sm:$0xff] }
 0x1b8   :  { %v333_v43 = vsel %vm326_vm3, %v330_v41, %v332_v36  ;;  %v350_v44 = vsel %vm346_vm4, %v341_v39, %v345_v40  ;;  %v331_v45 = vsel %vm326_vm3, %v328_v38, %v330_v41  ;;  %v3253_v36 = vld [vmem:[%s4579_s7 + $0x280] sm:$0xff]  ;;  %v3265_v38 = vld [vmem:[%s4579_s7 + $0x278] sm:$0xff]  ;;  %v3277_v40 = vld [vmem:[%s4579_s7 + $0x270] sm:$0xff]  ;;  %4704 = vst [vmem:[#allocation28_spill] sm:$0xff] %v3337_v50 }
 0x1b9   :  { %v340_v46 = vmax.f32 %v313_v37, %v333_v43  ;;  %v344_v47 = vmin.f32 %v313_v37, %v333_v43  ;;  %2610 = vmatprep.subr.msk.mxu1 %vm357_vm5, %v350_v44  ;;  %v339_v48 = vmax.f32 %v2606_v32, %v331_v45  ;;  %v343_v49 = vmin.f32 %v2606_v32, %v331_v45  ;;  %v3229_v32 = vld [vmem:[%s4579_s7 + $0x290] sm:$0xff]  ;;  %v3259_v37 = vld [vmem:[%s4579_s7 + $0x40] sm:$0xff]  ;;  %v3271_v39 = vld [vmem:[%s4579_s7 + $0x38] sm:$0xff] }
 0x1ba   :  { %2611 = vmatpush3.msk.msra.mxu1 %vm357_vm5, %v350_v44  ;;  %4695 = vst [vmem:[#allocation19_spill] sm:$0xff] %v3229_v32  ;;  %4697 = vst [vmem:[#allocation21_spill] sm:$0xff] %v3253_v36  ;;  %690 = vmatpush1.msra.mxu0 %v3229_v32  ;;  %v3283_v41 = vld [vmem:[%s4579_s7 + $0x30] sm:$0xff]  ;;  %v3295_v43 = vld [vmem:[%s4579_s7 + $0x28] sm:$0xff] }
 0x1bb   :  { %v349_v52 = vsel %vm346_vm4, %v340_v46, %v344_v47  ;;  %v348_v53 = vsel %vm346_vm4, %v339_v48, %v343_v49  ;;  %4698 = vst [vmem:[#allocation22_spill] sm:$0xff] %v3265_v38  ;;  %691 = vmatprep.subr.mxu0 %v3241_v34  ;;  %4699 = vst [vmem:[#allocation23_spill] sm:$0xff] %v3277_v40  ;;  %v3301_v44 = vld [vmem:[%s4579_s7 + $0x260] sm:$0xff]  ;;  %v3313_v46 = vld [vmem:[%s4579_s7 + $0x258] sm:$0xff] }
 0x1bc   :  { %2612 = vmatprep.subr.mxu1 %v349_v52  ;;  %692 = vmatpush1.msra.mxu0 %v3253_v36  ;;  %4701 = vst [vmem:[#allocation25_spill] sm:$0xff] %v3301_v44  ;;  %v3307_v45 = vld [vmem:[%s4579_s7 + $0x20] sm:$0xff]  ;;  %4702 = vst [vmem:[#allocation26_spill] sm:$0xff] %v3313_v46  ;;  %v3319_v47 = vld [vmem:[%s4579_s7 + $0x18] sm:$0xff] }
 0x1bd   :  { %2613 = vmatpush3.msra.mxu1 %v349_v52  ;;  %693 = vmatprep.subr.mxu0 %v3265_v38  ;;  %v3325_v48 = vld [vmem:[%s4579_s7 + $0x250] sm:$0xff]  ;;  %v3343_v51 = vld [vmem:[%s4579_s7 + $0x8] sm:$0xff]  ;;  %v3349_v52 = vld [vmem:[%s4579_s7 + $0x240] sm:$0xff] }
 0x1be   :  { %2614 = vmatprep.subr.mxu1 %v348_v53  ;;  %694 = vmatpush1.msra.mxu0 %v3277_v40  ;;  %4703 = vst [vmem:[#allocation27_spill] sm:$0xff] %v3325_v48  ;;  %v3331_v49 = vld [vmem:[%s4579_s7 + $0x10] sm:$0xff]  ;;  %4705 = vst [vmem:[#allocation29_spill] sm:$0xff] %v3349_v52  ;;  %v3409_v40 = vld [vmem:[%s4579_s7 + $0x218] sm:$0xff] }
 0x1bf   :  { %2615 = vmatpush3.msra.mxu1 %v348_v53  ;;  %695 = vmatprep.subr.mxu0 %v3289_v42  ;;  %v3355_v53 = vld [vmem:[%s4579_s7] sm:$0xff]  ;;  %4713 = vst [vmem:[#allocation37_spill] sm:$0xff] %v3409_v40  ;;  %v3421_v38 = vld [vmem:[%s4579_s7 + $0x210] sm:$0xff]  ;;  %v3433_v36 = vld [vmem:[%s4579_s7 + $0x208] sm:$0xff] }
 0x1c0   :  { %2616 = vmatprep.subr.mxu1 %v347_v54  ;;  %696 = vmatpush1.msra.mxu0 %v3301_v44  ;;  %v3385_v44 = vld [vmem:[%s4579_s7 + $0x228] sm:$0xff]  ;;  %v3397_v42 = vld [vmem:[%s4579_s7 + $0x220] sm:$0xff]  ;;  %4715 = vst [vmem:[#allocation39_spill] sm:$0xff] %v3421_v38  ;;  %4717 = vst [vmem:[#allocation41_spill] sm:$0xff] %v3433_v36 }
 0x1c1   :  { %2617 = vmatpush3.msra.mxu1 %v347_v54  ;;  %697 = vmatprep.subr.mxu0 %v3313_v46  ;;  %v3361_v54 = vld [vmem:[%s4579_s7 + $0x238] sm:$0xff]  ;;  %v3373_v46 = vld [vmem:[%s4579_s7 + $0x230] sm:$0xff]  ;;  %4709 = vst [vmem:[#allocation33_spill] sm:$0xff] %v3385_v44  ;;  %4711 = vst [vmem:[#allocation35_spill] sm:$0xff] %v3397_v42 }
 0x1c2   :  { %2619 = vmatmul.mubr.msk.f32.vlgmr.msra.gmra.mxu1 %vm215_vm1, %v59_v55  ;;  %600 = vmatprep.subr.mxu1 %v3030_v58  ;;  %4706 = vst [vmem:[#allocation30_spill] sm:$0xff] %v3361_v54  ;;  %v3367_v55 = vld [vmem:[%s4579_s7 + $0x1f8] sm:$0xff]  ;;  %4707 = vst [vmem:[#allocation31_spill] sm:$0xff] %v3373_v46  ;;  %v3445_v34 = vld [vmem:[%s4579_s7 + $0x200] sm:$0xff] }
 0x1c3   :  { %601 = vmatpush1.msra.mxu1 %v3035_v59  ;;  %698 = vmatpush1.msra.mxu0 %v3325_v48  ;;  %v3379_v48 = vld [vmem:[%s4579_s7 + $0x1f0] sm:$0xff]  ;;  %4719 = vst [vmem:[#allocation43_spill] sm:$0xff] %v3445_v34  ;;  %v3457_v32 = vld [vmem:[%s4579_s7 + $0x348] sm:$0xf] }
 0x1c4   :  { %602 = vmatprep.subr.mxu1 %v3040_v60  ;;  %699 = vmatprep.subr.mxu0 %v3337_v50  ;;  %4708 = vst [vmem:[#allocation32_spill] sm:$0xff] %v3379_v48  ;;  %v3391_v50 = vld [vmem:[%s4579_s7 + $0x1e8] sm:$0xff]  ;;  %4721 = vst [vmem:[#allocation45_spill] sm:$0xff] %v3457_v32 }
 0x1c5   :  { %603 = vmatpush1.msra.mxu1 %v3046_v61  ;;  %700 = vmatpush1.msra.mxu0 %v3349_v52  ;;  %4710 = vst [vmem:[#allocation34_spill] sm:$0xff] %v3391_v50  ;;  %v3403_v52 = vld [vmem:[%s4579_s7 + $0x1e0] sm:$0xff] }
 0x1c6   :  { %604 = vmatprep.subr.mxu1 %v3052_v62  ;;  %701 = vmatprep.subr.mxu0 %v3361_v54  ;;  %4712 = vst [vmem:[#allocation36_spill] sm:$0xff] %v3403_v52  ;;  %v3415_v54 = vld [vmem:[%s4579_s7 + $0x1d8] sm:$0xff] }
 0x1c7   :  { %605 = vmatpush1.msra.mxu1 %v3058_v63  ;;  %702 = vmatpush1.msra.mxu0 %v3373_v46  ;;  %4714 = vst [vmem:[#allocation38_spill] sm:$0xff] %v3415_v54  ;;  %v3427_v46 = vld [vmem:[%s4579_s7 + $0x1d0] sm:$0xff] }
 0x1c8   :  { %606 = vmatprep.subr.mxu1 %v3064_v0  ;;  %703 = vmatprep.subr.mxu0 %v3385_v44  ;;  %4716 = vst [vmem:[#allocation40_spill] sm:$0xff] %v3427_v46  ;;  %v3439_v44 = vld [vmem:[%s4579_s7 + $0x1c8] sm:$0xff] }
 0x1c9   :  { %607 = vmatpush1.msra.mxu1 %v3070_v1  ;;  %704 = vmatpush1.msra.mxu0 %v3397_v42  ;;  %4718 = vst [vmem:[#allocation42_spill] sm:$0xff] %v3439_v44  ;;  %v3451_v42 = vld [vmem:[%s4579_s7 + $0x1c0] sm:$0xff] }
 0x1ca   :  { %608 = vmatprep.subr.mxu1 %v3076_v2  ;;  %705 = vmatprep.subr.mxu0 %v3409_v40  ;;  %4720 = vst [vmem:[#allocation44_spill] sm:$0xff] %v3451_v42  ;;  %v3463_v40 = vld [vmem:[%s4579_s7 + $0x1b8] sm:$0xff] }
 0x1cb   :  { %609 = vmatpush1.msra.mxu1 %v3082_v3  ;;  %706 = vmatpush1.msra.mxu0 %v3421_v38  ;;  %4722 = vst [vmem:[#allocation46_spill] sm:$0xff] %v3463_v40  ;;  %v3475_v38 = vld [vmem:[%s4579_s7 + $0x1b0] sm:$0xff] }
 0x1cc   :  { %610 = vmatprep.subr.mxu1 %v3093_v5  ;;  %707 = vmatprep.subr.mxu0 %v3433_v36  ;;  %4724 = vst [vmem:[#allocation48_spill] sm:$0xff] %v3475_v38  ;;  %v3487_v36 = vld [vmem:[%s4579_s7 + $0x1a8] sm:$0xff] }
 0x1cd   :  { %611 = vmatpush1.msra.mxu1 %v3110_v11  ;;  %708 = vmatpush1.msra.mxu0 %v3445_v34  ;;  %4726 = vst [vmem:[#allocation50_spill] sm:$0xff] %v3487_v36  ;;  %v3500_v34 = vld [vmem:[%s4579_s7 + $0x1a0] sm:$0xff] }
 0x1ce   :  { %612 = vmatprep.subr.mxu1 %v3122_v13  ;;  %2384 = vmatprep.subr.msk.mxu0 %vm556_vm6, %v3457_v32  ;;  %4728 = vst [vmem:[#allocation52_spill] sm:$0xff] %v3500_v34  ;;  %v3513_v32 = vld [vmem:[%s4579_s7 + $0x198] sm:$0xff] }
 0x1cf   :  { %613 = vmatpush1.msra.mxu1 %v3139_v16  ;;  %2385 = vmatpush2.msk.msra.mxu0 %vm556_vm6, %v3469_v29  ;;  %4730 = vst [vmem:[#allocation54_spill] sm:$0xff] %v3513_v32  ;;  %v3520_v29 = vld [vmem:[%s4579_s7 + $0x190] sm:$0xff] }
 0x1d0   :  { %614 = vmatprep.subr.mxu1 %v3151_v18  ;;  %733 = vmatprep.subr.mxu0 %v3481_v27  ;;  %4731 = vst [vmem:[#allocation55_spill] sm:$0xff] %v3520_v29  ;;  %v3534_v27 = vld [vmem:[%s4579_s7 + $0x180] sm:$0xff] }
 0x1d1   :  { %615 = vmatpush1.msra.mxu1 %v3163_v20  ;;  %734 = vmatpush2.msra.mxu0 %v3494_v25  ;;  %4733 = vst [vmem:[#allocation57_spill] sm:$0xff] %v3534_v27  ;;  %v3540_v25 = vld [vmem:[%s4579_s7 + $0x178] sm:$0xff] }
 0x1d2   :  { %616 = vmatprep.subr.mxu1 %v3175_v22  ;;  %735 = vmatprep.subr.mxu0 %v3507_v23  ;;  %4734 = vst [vmem:[#allocation58_spill] sm:$0xff] %v3540_v25  ;;  %v3546_v23 = vld [vmem:[%s4579_s7 + $0x170] sm:$0xff] }
 0x1d3   :  { %617 = vmatpush1.msra.mxu1 %v3187_v24  ;;  %4735 = vst [vmem:[#allocation59_spill] sm:$0xff] %v3546_v23 }
 0x1d4   :  { %618 = vmatprep.subr.mxu1 %v3199_v26 }
 0x1d5   :  { %619 = vmatpush1.msra.mxu1 %v3211_v28 }
 0x1d6   :  { %620 = vmatprep.subr.mxu1 %v3223_v30 }
 0x1d7   :  { %621 = vmatpush1.msra.mxu1 %v3235_v33 }
 0x1d8   :  { %622 = vmatprep.subr.mxu1 %v3247_v35 }
 0x1d9   :  { %623 = vmatpush1.msra.mxu1 %v3259_v37 }
 0x1da   :  { %624 = vmatprep.subr.mxu1 %v3271_v39 }
 0x1db   :  { %625 = vmatpush1.msra.mxu1 %v3283_v41 }
 0x1dc   :  { %626 = vmatprep.subr.mxu1 %v3295_v43 }
 0x1dd   :  { %627 = vmatpush1.msra.mxu1 %v3307_v45 }
 0x1de   :  { %628 = vmatprep.subr.mxu1 %v3319_v47 }
 0x1df   :  { %629 = vmatpush1.msra.mxu1 %v3331_v49 }
 0x1e0   :  { %630 = vmatprep.subr.mxu1 %v3343_v51 }
 0x1e1   :  { %631 = vmatpush1.msra.mxu1 %v3355_v53 }
 0x1e2   :  { %632 = vmatprep.subr.mxu1 %v3367_v55 }
 0x1e3   :  { %633 = vmatpush2.msra.mxu1 %v3379_v48 }
 0x1e4   :  { %634 = vmatprep.subr.mxu1 %v3391_v50 }
 0x1e5   :  { %635 = vmatpush2.msra.mxu1 %v3403_v52 }
 0x1e6   :  { %636 = vmatprep.subr.mxu1 %v3415_v54  ;;  %v4671_v54 = vmov 0.0  }
 0x1e7   :  { %637 = vmatpush2.msra.mxu1 %v3427_v46 }
 0x1e8   :  { %638 = vmatprep.subr.mxu1 %v3439_v44 }
 0x1e9   :  { %639 = vmatpush2.msra.mxu1 %v3451_v42 }
 0x1ea   :  { %640 = vmatprep.subr.mxu1 %v3463_v40 }
 0x1eb   :  { %641 = vmatpush2.msra.mxu1 %v3475_v38 }
 0x1ec   :  { %642 = vmatprep.subr.mxu1 %v3487_v36 }
 0x1ed   :  { %643 = vmatpush2.msra.mxu1 %v3500_v34 }
 0x1ee   :  { %644 = vmatprep.subr.mxu1 %v3513_v32 }
 0x1ef   :  { %645 = vmatpush2.msra.mxu1 %v3520_v29 }
 0x1f0   :  { %646 = vmatprep.subr.mxu1 %v3527_v21 }
 0x1f1   :  { %647 = vmatpush2.msra.mxu1 %v3534_v27 }
 0x1f2   :  { %648 = vmatprep.subr.mxu1 %v3540_v25 }
 0x1f3   :  { %649 = vmatpush2.msra.mxu1 %v3546_v23 }
 0x1f4   :  { %650 = vmatprep.subr.mxu1 %v3552_v19 }
 0x1f5   :  { %651 = vmatpush2.msra.mxu1 %v3558_v17 }
 0x1f6   :  { %652 = vmatprep.subr.mxu1 %v3564_v15 }
 0x1f7   :  { %653 = vmatpush2.msra.mxu1 %v3570_v14 }
 0x1f8   :  { %654 = vmatprep.subr.mxu1 %v3576_v12 }
 0x1f9   :  { %655 = vmatpush2.msra.mxu1 %v3582_v7 }
 0x1fa   :  { %656 = vmatprep.subr.mxu1 %v3588_v6 }
 0x1fb   :  { %657 = vmatpush2.msra.mxu1 %v3594_v4 }
 0x282   :  { %v2999_v56 = vpop.f32.mrf.mxu1 }
 0x283   :  { %440 = vrot.lane.b32.xlu1 %v2999_v56, %s2818_s17 }
 0x284   :  { %v3003_v57 = vpop.f32.mrf.mxu1 }
 0x285   :  { %438 = vrot.lane.b32.xlu0 %v3003_v57, %s2818_s17 }
 0x287   :  { %492 = vrot.lane.b32.xlu1 %v2999_v56, %s2819_s18 }
 0x289   :  { %490 = vrot.lane.b32.xlu0 %v3003_v57, %s2819_s18 }
 0x28b   :  { %446 = vrot.lane.b32.xlu1 %v2999_v56, %s2820_s19 }
 0x28d   :  { %444 = vrot.lane.b32.xlu0 %v3003_v57, %s2820_s19 }
 0x28f   :  { %452 = vrot.lane.b32.xlu1 %v2999_v56, %s2821_s20 }
 0x291   :  { %450 = vrot.lane.b32.xlu0 %v3003_v57, %s2821_s20 }
 0x293   :  { %458 = vrot.lane.b32.xlu1 %v2999_v56, %s4588_s21 }
 0x295   :  { %456 = vrot.lane.b32.xlu0 %v3003_v57, %s4588_s21 }
 0x297   :  { %464 = vrot.lane.b32.xlu1 %v2999_v56, %s2823_s23 }
 0x299   :  { %462 = vrot.lane.b32.xlu0 %v3003_v57, %s2823_s23 }
 0x2f5   :  { %v441_v15 = vpop.permute.xlu1 %440 }
 0x2f6   :  { %v469_v29 = vsel %vm346_vm4, %v2999_v56, %v441_v15 }
 0x2f7   :  { %v439_v14 = vpop.permute.xlu0 %438 }
 0x2f9   :  { %v493_v17 = vpop.permute.xlu1 %492 }
 0x2fa   :  { %v497_v12 = vsel %vm346_vm4, %v493_v17, %v2999_v56  ;;  %v3617_v56 = vld [vmem:[%s4577_s5] ss:$0 sm:$0xff] }
 0x2fb   :  { %v491_v19 = vpop.permute.xlu0 %490  ;;  %v499_v6 = vsel %vm470_vm7, %v497_v12, %v441_v15  ;;  %4744 = vst [vmem:[#allocation68_spill] sm:$0xff] %v3617_v56 }
 0x2fc   :  { %v496_v7 = vsel %vm346_vm4, %v491_v19, %v3003_v57  ;;  %v468_v19 = vsel %vm346_vm4, %v3003_v57, %v439_v14 }
 0x2fd   :  { %v447_v23 = vpop.permute.xlu1 %446  ;;  %v498_v17 = vsel %vm470_vm7, %v496_v7, %v439_v14  ;;  %v3623_v7 = vld [vmem:[%s4576_s4] ss:$0 sm:$0xff] }
 0x2fe   :  { %v501_v32 = vsel %vm473_vm8, %v499_v6, %v447_v23  ;;  %v472_v34 = vsel %vm470_vm7, %v469_v29, %v447_v23  ;;  %4745 = vst [vmem:[#allocation69_spill] sm:$0xff] %v3623_v7 }
 0x2ff   :  { %v445_v25 = vpop.permute.xlu0 %444 }
 0x300   :  { %v500_v40 = vsel %vm473_vm8, %v498_v17, %v445_v25  ;;  %v471_v15 = vsel %vm470_vm7, %v468_v19, %v445_v25  ;;  %v3637_v25 = vld [vmem:[%s4578_s6] ss:$0 sm:$0xff]  ;;  %s2827_s6 = smov 124  }
 0x301   :  { %v453_v27 = vpop.permute.xlu1 %452  ;;  %4746 = vst [vmem:[#allocation70_spill] sm:$0xff] %v3637_v25 }
 0x302   :  { %v503_v36 = vsel %vm476_vm9, %v501_v32, %v453_v27  ;;  %v475_v12 = vsel %vm473_vm8, %v472_v34, %v453_v27 }
 0x303   :  { %v451_v21 = vpop.permute.xlu0 %450 }
 0x304   :  { %v502_v57 = vsel %vm476_vm9, %v500_v40, %v451_v21  ;;  %v474_v27 = vsel %vm473_vm8, %v471_v15, %v451_v21  ;;  %v3647_v15 = vld [vmem:[%s4579_s7 + $0x128] sm:$0xff] }
 0x305   :  { %v459_v4 = vpop.permute.xlu1 %458  ;;  %4747 = vst [vmem:[#allocation71_spill] sm:$0xff] %v3647_v15  ;;  %658 = vmatprep.subr.mxu1 %v3647_v15 }
 0x306   :  { %v505_v6 = vsel %vm479_vm10, %v503_v36, %v459_v4  ;;  %v478_v14 = vsel %vm476_vm9, %v475_v12, %v459_v4 }
 0x307   :  { %v457_v38 = vpop.permute.xlu0 %456  ;;  %v513_v34 = vmul.f32 %v3617_v56, %v505_v6 }
 0x308   :  { %v504_v29 = vsel %vm479_vm10, %v502_v57, %v457_v38  ;;  %v477_v36 = vsel %vm476_vm9, %v474_v27, %v457_v38  ;;  %v3659_v57 = vld [vmem:[%s4579_s7 + $0x120] sm:$0xff]  ;;  %v3676_v27 = vld [vmem:[%s4579_s7 + $0x310] sm:$0xff] }
 0x309   :  { %v465_v23 = vpop.permute.xlu1 %464  ;;  %v512_v21 = vmul.f32 %v3617_v56, %v504_v29  ;;  %4749 = vst [vmem:[#allocation73_spill] sm:$0xff] %v3659_v57  ;;  %659 = vmatpush2.msra.mxu1 %v3659_v57  ;;  %4752 = vst [vmem:[#allocation76_spill] sm:$0xff] %v3676_v27  ;;  %v3681_v29 = vld [vmem:[%s4579_s7 + $0x110] sm:$0xff] }
 0x30a   :  { %v481_v32 = vsel %vm479_vm10, %v478_v14, %v465_v23  ;;  %v3664_v14 = vld [vmem:[%s4579_s7 + $0x318] sm:$0xff]  ;;  %4753 = vst [vmem:[#allocation77_spill] sm:$0xff] %v3681_v29 }
 0x30b   :  { %v489_v17 = vmul.f32 %v3623_v7, %v481_v32  ;;  %v463_v42 = vpop.permute.xlu0 %462  ;;  %4750 = vst [vmem:[#allocation74_spill] sm:$0xff] %v3664_v14  ;;  %v3669_v23 = vld [vmem:[%s4579_s7 + $0x118] sm:$0xff]  ;;  %v3686_v32 = vld [vmem:[%s4579_s7 + $0x308] sm:$0xff] }
 0x30c   :  { %v480_v4 = vsel %vm479_vm10, %v477_v36, %v463_v42  ;;  %v3652_v42 = vld [vmem:[%s4579_s7 + $0x320] sm:$0xff]  ;;  %4751 = vst [vmem:[#allocation75_spill] sm:$0xff] %v3669_v23  ;;  %4754 = vst [vmem:[#allocation78_spill] sm:$0xff] %v3686_v32  ;;  %660 = vmatprep.subr.mxu1 %v3669_v23 }
 0x30d   :  { %v515_v40 = vadd.f32 %v513_v34, %v489_v17  ;;  %v488_v19 = vmul.f32 %v3623_v7, %v480_v4  ;;  %4748 = vst [vmem:[#allocation72_spill] sm:$0xff] %v3652_v42  ;;  %736 = vmatpush2.msra.mxu0 %v3652_v42  ;;  %661 = vmatpush2.msra.mxu1 %v3681_v29  ;;  %v3695_v34 = vld [vmem:[%s4579_s7 + $0x108] sm:$0xff]  ;;  %v3700_v36 = vld [vmem:[%s4579_s7 + $0x300] sm:$0xff] }
 0x30e   :  { %737 = vmatprep.subr.mxu0 %v3664_v14  ;;  %4755 = vst [vmem:[#allocation79_spill] sm:$0xff] %v3695_v34  ;;  %4756 = vst [vmem:[#allocation80_spill] sm:$0xff] %v3700_v36  ;;  %662 = vmatprep.subr.mxu1 %v3695_v34  ;;  %v3707_v17 = vld [vmem:[%s4579_s7 + $0x100] sm:$0xff]  ;;  %s2824_s7 = smov 40  }
 0x30f   :  { %v523_v12 = vadd.f32 %v3637_v25, %v515_v40  ;;  %v514_v6 = vadd.f32 %v512_v21, %v488_v19  ;;  %738 = vmatpush2.msra.mxu0 %v3676_v27  ;;  %4757 = vst [vmem:[#allocation81_spill] sm:$0xff] %v3707_v17  ;;  %663 = vmatpush2.msra.mxu1 %v3707_v17 }
 0x310   :  { %739 = vmatprep.subr.mxu0 %v3686_v32 }
 0x311   :  { %2763 = vtanh.f32 %v523_v12  ;;  %v522_v38 = vadd.f32 %v3637_v25, %v514_v6  ;;  %740 = vmatpush2.msra.mxu0 %v3700_v36 }
 0x313   :  { %2765 = vtanh.f32 %v522_v38 }
 0x31e   :  { %v3709_v4 = vpop.eup %2763 }
 0x31f   :  { %v538_v19 = vrot.slane %v3709_v4, 2  ;;  %v529_v6 = vrot.slane %v3709_v4, 1  ;;  %v558_v27 = vrot.slane %v3709_v4, 4  ;;  %v548_v14 = vrot.slane %v3709_v4, 3 }
 0x320   :  { %v2766_v21 = vpop.eup %2765 }
 0x321   :  { %v537_v40 = vrot.slane %v2766_v21, 2  ;;  %v528_v12 = vrot.slane %v2766_v21, 1  ;;  %v557_v36 = vrot.slane %v2766_v21, 4  ;;  %v547_v32 = vrot.slane %v2766_v21, 3 }
 0x323   :  { %v539_v38 = vsel %vm233_vm0, %v537_v40, %v538_v19  ;;  %v530_v25 = vsel %vm326_vm3, %v528_v12, %v529_v6  ;;  %v559_v42 = vsel %vm556_vm6, %v557_v36, %v558_v27  ;;  %v549_v40 = vsel %vm4657_vm11, %v547_v32, %v548_v14 }
 0x324   :  { %v2746_v7 = vpack.i.bf16 %v538_v19, %v539_v38  ;;  %v2741_v56 = vpack.i.bf16 %v529_v6, %v530_v25  ;;  %v3743_v25 = vld [vmem:[%s4572_s0 + $0x30] sm:$0xff]  ;;  %vm4670_vm11 = vcmask 687104  }
 0x326   :  { %2747 = vrot.lane.b32.xlu1 %v2746_v7, %s2824_s7  ;;  %2742 = vrot.lane.b32.xlu0 %v2741_v56, %s2825_s26  ;;  %v3729_v56 = vld [vmem:[%s4572_s0 + $0x20] sm:$0xff]  ;;  %v3734_v7 = vld [vmem:[%s4572_s0 + $0x28] sm:$0xff] }
 0x32a   :  { %560 = vrot.lane.b32.xlu1 %v559_v42, %s2826_s28  ;;  %550 = vrot.lane.b32.xlu0 %v549_v40, %s2827_s6  ;;  %v3748_v42 = vld [vmem:[%s4572_s0 + $0x38] sm:$0xf] }
 0x32e   :  { %562 = vrot.lane.b32.xlu1 %v558_v27, %s2826_s28  ;;  %552 = vrot.lane.b32.xlu0 %v548_v14, %s2827_s6 }
 0x332   :  { %990 = vrot.lane.b32.xlu0 %v3729_v56, %s2816_s22  ;;  %992 = vrot.lane.b32.xlu1 %v3734_v7, %s2816_s22 }
 0x336   :  { %994 = vrot.lane.b32.xlu0 %v3743_v25, %s2816_s22  ;;  %996 = vrot.lane.b32.xlu1 %v3748_v42, %s2816_s22 }
 0x398   :  { %v2748_v14 = vpop.permute.xlu1 %2747  ;;  %v2743_v27 = vpop.permute.xlu0 %2742 }
 0x399   :  { %v2749_v32 = vunpack.i.l.bf16 %v2748_v14  ;;  %v2744_v36 = vunpack.i.l.bf16 %v2743_v27  ;;  %v2750_v12 = vunpack.i.h.bf16 %v2748_v14  ;;  %v2745_v6 = vunpack.i.h.bf16 %v2743_v27 }
 0x39b   :  { %v570_v19 = vsel %vm569_vm12, %v2744_v36, %v2749_v32  ;;  %v567_v29 = vsel %vm4670_vm11, %v2766_v21, %v2744_v36  ;;  %v571_v32 = vsel %vm569_vm12, %v2745_v6, %v2750_v12 }
 0x39c   :  { %v561_v38 = vpop.permute.xlu1 %560  ;;  %v551_v40 = vpop.permute.xlu0 %550 }
 0x39d   :  { %v576_v17 = vsel %vm575_vm13, %v551_v40, %v561_v38  ;;  %2386 = vmatprep.mubr.msk.f32.mxu0 %vm589_vm14, %v561_v38  ;;  %v573_v34 = vsel %vm4675_vm15, %v570_v19, %v551_v40  ;;  %v568_v19 = vsel %vm4670_vm11, %v3709_v4, %v2745_v6  ;;  %vm4681_vm11 = vcmask 1039360  }
 0x39e   :  { %664 = vmatprep.mubr.f32.mxu1 %v573_v34  ;;  %742 = vmatmul.mubr.f32.vlgmr.msra.gmra.mxu0 %v576_v17 }
 0x39f   :  { %665 = vmatmul.mubr.f32.vlgmr.msra.gmra.mxu1 %v567_v29  ;;  %v4663_v29 = vlaneseq }
 0x3a0   :  { %v563_v23 = vpop.permute.xlu1 %562  ;;  %v553_v57 = vpop.permute.xlu0 %552 }
 0x3a1   :  { %2387 = vmatprep.mubr.msk.f32.mxu0 %vm589_vm14, %v563_v23  ;;  %v574_v14 = vsel %vm4675_vm15, %v571_v32, %v553_v57  ;;  %v577_v27 = vsel %vm575_vm13, %v553_v57, %v563_v23  ;;  %v3768_v34 = vshrl.u32 %v4663_v29, 7  ;;  %v170_v57 = vld [vmem:[%s4580_s8] sm:$0x3]  ;;  %vm799_vm15 = vcmask 1040384  }
 0x3a2   :  { %670 = vmatprep.mubr.f32.mxu1 %v574_v14  ;;  %748 = vmatmul.mubr.f32.gmra.mxu0 %v577_v27 }
 0x3a3   :  { %671 = vmatmul.mubr.f32.gmra.mxu1 %v568_v19  ;;  %4758 = vst [vmem:[#allocation82_spill] sm:$0xff] %v3768_v34  ;;  %v581_v21 = vsub.s32 0, %v3768_v34  ;;  %v585_v12 = vsub.s32 1, %v3768_v34  ;;  %870 = vmatprep.mubr.f32.mxu0 %v4671_v54 }
 0x3a4   :  { %2649 = vmatprep.mubr.msk.f32.mxu1 %vm215_vm1, %v2982_v31  ;;  %v991_v44 = vpop.permute.xlu0 %990 }
 0x3a5   :  { %v3775_v6 = vrot.slane %v170_v57, %v581_v21  ;;  %v3777_v40 = vrot.slane %v170_v57, %v585_v12  ;;  %v3784_v21 = vpop.permute.xlu1 %992 }
 0x3a7   :  { %4759 = vst [vmem:[#allocation83_spill] sm:$0xff] %v3775_v6  ;;  %4760 = vst [vmem:[#allocation84_spill] sm:$0xff] %v3777_v40 }
 0x45e   :  { %v743_v17 = vpop.f32.mrf.mxu0 }
 0x45f   :  { %v666_v23 = vpop.f32.mrf.mxu1 }
 0x460   :  { %v745_v36 = vpop.f32.mrf.mxu0  ;;  %v667_v27 = vadd.f32 %v666_v23, %v3775_v6  ;;  %v1006_v23 = vmin.f32 %v3729_v56, %v991_v44 }
 0x461   :  { %v668_v4 = vpop.f32.mrf.mxu1 }
 0x462   :  { %v749_v38 = vpop.f32.mrf.mxu0  ;;  %v669_v46 = vadd.f32 %v668_v4, %v3777_v40  ;;  %v744_v57 = vadd.f32 %v743_v17, %v667_v27 }
 0x463   :  { %v672_v31 = vpop.f32.mrf.mxu1 }
 0x464   :  { %v673_v32 = vadd.f32 %v672_v31, %v3775_v6  ;;  %v751_v15 = vpop.f32.mrf.mxu0  ;;  %v746_v12 = vadd.f32 %v745_v36, %v669_v46 }
 0x465   :  { %v674_v14 = vpop.f32.mrf.mxu1 }
 0x466   :  { %v750_v19 = vadd.f32 %v749_v38, %v673_v32  ;;  %v675_v29 = vadd.f32 %v674_v14, %v3777_v40  ;;  %v3790_v38 = vpop.permute.xlu0 %994 }
 0x467   :  { %v1008_v17 = vmin.f32 %v3743_v25, %v3790_v38 }
 0x468   :  { %v752_v34 = vadd.f32 %v751_v15, %v675_v29  ;;  %762 = vrot.lane.b32.xlu0 %v750_v19, %s2816_s22  ;;  %v1007_v15 = vmin.f32 %v3734_v7, %v3784_v21  ;;  %v3795_v29 = vpop.permute.xlu1 %996 }
 0x469   :  { %v1009_v46 = vmin.f32 %v3748_v42, %v3795_v29 }
 0x46a   :  { %764 = vrot.lane.b32.xlu1 %v752_v34, %s2816_s22 }
 0x46c   :  { %758 = vrot.lane.b32.xlu0 %v744_v57, %s2816_s22 }
 0x46e   :  { %760 = vrot.lane.b32.xlu1 %v746_v12, %s2816_s22 }
 0x470   :  { %1014 = vrot.lane.b32.xlu0 %v1006_v23, %s2817_s27 }
 0x472   :  { %1016 = vrot.lane.b32.xlu1 %v1007_v15, %s2817_s27 }
 0x474   :  { %1018 = vrot.lane.b32.xlu0 %v1008_v17, %s2817_s27 }
 0x476   :  { %1020 = vrot.lane.b32.xlu1 %v1009_v46, %s2817_s27 }
 0x4da   :  { %v763_v36 = vpop.permute.xlu0 %762 }
 0x4dc   :  { %v765_v4 = vpop.permute.xlu1 %764 }
 0x4dd   :  { %v768_v31 = vsel %vm4681_vm11, %v763_v36, %v765_v4  ;;  %v776_v32 = vmax.f32 %v752_v34, %v765_v4 }
 0x4de   :  { %v775_v14 = vmax.f32 %v750_v19, %v768_v31  ;;  %v759_v54 = vpop.permute.xlu0 %758 }
 0x4df   :  { %v785_v27 = vrot.slane %v776_v32, 1 }
 0x4e0   :  { %v782_v23 = vrot.slane %v775_v14, 1  ;;  %v761_v40 = vpop.permute.xlu1 %760 }
 0x4e1   :  { %v794_v15 = vmax.f32 %v776_v32, %v785_v27  ;;  %v767_v6 = vsel %vm4681_vm11, %v759_v54, %v761_v40  ;;  %v774_v52 = vmax.f32 %v746_v12, %v761_v40  ;;  %v3814_v54 = vld [vmem:[%s4575_s3] sm:$0x1f]  ;;  %vm795_vm11 = vcmask 72704   ;;  %v2791_v32 = vld [vmem:[%s4573_s1 + $0x8] sm:$0xff] }
 0x4e2   :  { %v793_v50 = vmax.f32 %v775_v14, %v782_v23  ;;  %v773_v17 = vmax.f32 %v744_v57, %v767_v6  ;;  %v1015_v31 = vpop.permute.xlu0 %1014  ;;  %v1002_v6 = vmax.f32 %v3729_v56, %v991_v44  ;;  %v2788_v44 = vld [vmem:[%s4573_s1 + $0x28] sm:$0xff]  ;;  %v1003_v57 = vmax.f32 %v3734_v7, %v3784_v21 }
 0x4e3   :  { %v784_v48 = vrot.slane %v774_v52, 1  ;;  %2388 = vmatprep.subr.msk.mxu0 %vm799_vm15, %v794_v15  ;;  %v1004_v14 = vmax.f32 %v3743_v25, %v3790_v38  ;;  %v1005_v21 = vmax.f32 %v3748_v42, %v3795_v29 }
 0x4e4   :  { %v781_v46 = vrot.slane %v773_v17, 1  ;;  %2389 = vmatpush1.msk.msra.mxu0 %vm799_vm15, %v793_v50  ;;  %v1026_v40 = vsel %vm215_vm1, %v1002_v6, %v1015_v31  ;;  %v2789_v50 = vld [vmem:[%s4573_s1 + $0x20] sm:$0xff]  ;;  %v1017_v56 = vpop.permute.xlu1 %1016 }
 0x4e5   :  { %v786_v34 = vsel %vm326_vm3, %v784_v48, %v785_v27  ;;  %v2787_v48 = vld [vmem:[%s4573_s1 + $0x30] sm:$0x3f]  ;;  %v1027_v27 = vsel %vm215_vm1, %v1003_v57, %v1017_v56 }
 0x4e6   :  { %v783_v19 = vsel %vm326_vm3, %v781_v46, %v782_v23  ;;  %v792_v36 = vmax.f32 %v774_v52, %v786_v34  ;;  %v2790_v52 = vld [vmem:[%s4573_s1 + $0x18] sm:$0xff]  ;;  %v1019_v12 = vpop.permute.xlu0 %1018 }
 0x4e7   :  { %v791_v4 = vmax.f32 %v773_v17, %v783_v19 }
 0x4e8   :  { %836 = vmatprep.subr.mxu0 %v792_v36  ;;  %v1021_v7 = vpop.permute.xlu1 %1020 }
 0x4e9   :  { %837 = vmatpush1.msra.mxu0 %v791_v4 }
 0x4ea   :  { %2390 = vmatmul.mubr.msk.f32.vlgmr.msra.gmra.mxu0 %vm795_vm11, %v3814_v54  ;;  %2621 = vmatprep.subr.msk.mxu0 %vm233_vm0, %v2787_v48 }
 0x4eb   :  { %2622 = vmatpush3.msk.msra.mxu0 %vm233_vm0, %v2787_v48  ;;  %2635 = vmatprep.mubr.msk.f32.mxu0 %vm220_vm2, %v1026_v40 }
 0x4ec   :  { %2623 = vmatprep.subr.mxu0 %v2788_v44 }
 0x4ed   :  { %2624 = vmatpush3.msra.mxu0 %v2788_v44 }
 0x4ee   :  { %2625 = vmatprep.subr.mxu0 %v2789_v50 }
 0x4ef   :  { %2626 = vmatpush3.msra.mxu0 %v2789_v50 }
 0x4f0   :  { %2627 = vmatprep.subr.mxu0 %v2790_v52 }
 0x4f1   :  { %2628 = vmatpush3.msra.mxu0 %v2790_v52 }
 0x4f2   :  { %2629 = vmatprep.subr.mxu0 %v2949_v8 }
 0x4f3   :  { %2630 = vmatpush3.msra.mxu0 %v2949_v8  ;;  %v2792_v8 = vld [vmem:[%s4573_s1] sm:$0xff] }
 0x4f4   :  { %2631 = vmatprep.subr.mxu0 %v2955_v9  ;;  %v1028_v9 = vsel %vm215_vm1, %v1004_v14, %v1019_v12  ;;  %v2793_v14 = vld [vmem:[%s4574_s2 + $0x8] sm:$0x3f]  ;;  %s4834_s2 = smov 56  }
 0x4f5   :  { %2632 = vmatpush3.msra.mxu0 %v2791_v32 }
 0x4f6   :  { %2633 = vmatprep.subr.mxu0 %v2963_v10  ;;  %v1029_v10 = vsel %vm215_vm1, %v1005_v21, %v1021_v7  ;;  %v4795_v7 = vld [vmem:[#allocation9_spill] sm:$0xff]  ;;  %v4796_v21 = vld [vmem:[#allocation10_spill] sm:$0xff] }
 0x4f7   :  { %2634 = vmatpush3.msra.mxu0 %v2792_v8  ;;  %v4793_v8 = vld [vmem:[#allocation7_spill] sm:$0xff] }
 0x4f8   :  { %2636 = vmatmul.mubr.msk.f32.vlgmr.msra.gmra.mxu0 %vm220_vm2, %v1027_v27  ;;  %1350 = vmatprep.subr.mxu0 %v3030_v58  ;;  %v4761_v58 = vld [vmem:[#allocation32_spill] sm:$0xff]  ;;  %v4792_v27 = vld [vmem:[#allocation6_spill] sm:$0xff] }
 0x4f9   :  { %2638 = vmatprep.mubr.msk.f32.mxu0 %vm220_vm2, %v1028_v9  ;;  %1351 = vmatpush1.msra.mxu0 %v3035_v59  ;;  %v4762_v59 = vld [vmem:[#allocation34_spill] sm:$0xff]  ;;  %v4794_v9 = vld [vmem:[#allocation8_spill] sm:$0xff] }
 0x4fa   :  { %1352 = vmatprep.subr.mxu0 %v3040_v60  ;;  %v4763_v60 = vld [vmem:[#allocation36_spill] sm:$0xff] }
 0x4fb   :  { %1353 = vmatpush1.msra.mxu0 %v3046_v61  ;;  %v4764_v61 = vld [vmem:[#allocation38_spill] sm:$0xff] }
 0x4fc   :  { %2639 = vmatmul.mubr.msk.f32.gmra.mxu0 %vm220_vm2, %v1029_v10  ;;  %1354 = vmatprep.subr.mxu0 %v3052_v62  ;;  %v4765_v62 = vld [vmem:[#allocation40_spill] sm:$0xff]  ;;  %v4797_v10 = vld [vmem:[#allocation11_spill] sm:$0xff]  ;;  %vm4838_vm2 = vcmask 1044480  }
 0x4fd   :  { %1355 = vmatpush1.msra.mxu0 %v3058_v63  ;;  %v4766_v63 = vld [vmem:[#allocation42_spill] sm:$0xff] }
 0x4fe   :  { %1356 = vmatprep.subr.mxu0 %v3064_v0  ;;  %v4767_v0 = vld [vmem:[#allocation44_spill] sm:$0xff] }
 0x4ff   :  { %1357 = vmatpush1.msra.mxu0 %v3070_v1  ;;  %v4768_v1 = vld [vmem:[#allocation46_spill] sm:$0xff] }
 0x500   :  { %1358 = vmatprep.subr.mxu0 %v3076_v2  ;;  %v4769_v2 = vld [vmem:[#allocation48_spill] sm:$0xff] }
 0x501   :  { %1359 = vmatpush1.msra.mxu0 %v3082_v3  ;;  %v4770_v3 = vld [vmem:[#allocation50_spill] sm:$0xff] }
 0x502   :  { %1360 = vmatprep.subr.mxu0 %v3093_v5  ;;  %v4771_v5 = vld [vmem:[#allocation52_spill] sm:$0xff] }
 0x503   :  { %1361 = vmatpush1.msra.mxu0 %v3110_v11  ;;  %v4772_v11 = vld [vmem:[#allocation54_spill] sm:$0xff] }
 0x504   :  { %1362 = vmatprep.subr.mxu0 %v3122_v13  ;;  %v4773_v13 = vld [vmem:[#allocation55_spill] sm:$0xff] }
 0x505   :  { %1363 = vmatpush1.msra.mxu0 %v3139_v16  ;;  %v4774_v16 = vld [vmem:[#allocation56_spill] sm:$0xff] }
 0x506   :  { %1364 = vmatprep.subr.mxu0 %v3151_v18  ;;  %v4775_v18 = vld [vmem:[#allocation57_spill] sm:$0xff] }
 0x507   :  { %1365 = vmatpush1.msra.mxu0 %v3163_v20  ;;  %v4776_v20 = vld [vmem:[#allocation58_spill] sm:$0xff] }
 0x508   :  { %1366 = vmatprep.subr.mxu0 %v3175_v22  ;;  %v4777_v22 = vld [vmem:[#allocation59_spill] sm:$0xff] }
 0x509   :  { %1367 = vmatpush1.msra.mxu0 %v3187_v24  ;;  %v4778_v24 = vld [vmem:[#allocation60_spill] sm:$0xff] }
 0x50a   :  { %1368 = vmatprep.subr.mxu0 %v3199_v26  ;;  %v4779_v26 = vld [vmem:[#allocation61_spill] sm:$0xff] }
 0x50b   :  { %1369 = vmatpush1.msra.mxu0 %v3211_v28  ;;  %v4780_v28 = vld [vmem:[#allocation62_spill] sm:$0xff] }
 0x50c   :  { %1370 = vmatprep.subr.mxu0 %v3223_v30  ;;  %v4781_v30 = vld [vmem:[#allocation63_spill] sm:$0xff] }
 0x50d   :  { %1371 = vmatpush1.msra.mxu0 %v3235_v33  ;;  %v4782_v33 = vld [vmem:[#allocation64_spill] sm:$0xff] }
 0x50e   :  { %1372 = vmatprep.subr.mxu0 %v3247_v35  ;;  %v4783_v35 = vld [vmem:[#allocation65_spill] sm:$0xff] }
 0x50f   :  { %1373 = vmatpush1.msra.mxu0 %v3259_v37  ;;  %v4784_v37 = vld [vmem:[#allocation66_spill] sm:$0xff] }
 0x510   :  { %1374 = vmatprep.subr.mxu0 %v3271_v39  ;;  %v4785_v39 = vld [vmem:[#allocation67_spill] sm:$0xff] }
 0x511   :  { %1375 = vmatpush1.msra.mxu0 %v3283_v41  ;;  %v4786_v41 = vld [vmem:[#allocation71_spill] sm:$0xff] }
 0x512   :  { %1376 = vmatprep.subr.mxu0 %v3295_v43  ;;  %v4787_v43 = vld [vmem:[#allocation73_spill] sm:$0xff] }
 0x513   :  { %1377 = vmatpush1.msra.mxu0 %v3307_v45  ;;  %v4788_v45 = vld [vmem:[#allocation75_spill] sm:$0xff] }
 0x514   :  { %1378 = vmatprep.subr.mxu0 %v3319_v47  ;;  %v4789_v47 = vld [vmem:[#allocation77_spill] sm:$0xff] }
 0x515   :  { %1379 = vmatpush1.msra.mxu0 %v3331_v49  ;;  %v4790_v49 = vld [vmem:[#allocation79_spill] sm:$0xff] }
 0x516   :  { %1380 = vmatprep.subr.mxu0 %v3343_v51  ;;  %v4791_v51 = vld [vmem:[#allocation81_spill] sm:$0xff] }
 0x517   :  { %1381 = vmatpush1.msra.mxu0 %v3355_v53 }
 0x518   :  { %1382 = vmatprep.subr.mxu0 %v3367_v55 }
 0x519   :  { %1383 = vmatpush2.msra.mxu0 %v4761_v58  ;;  %v4798_v58 = vld [vmem:[#allocation12_spill] sm:$0xff] }
 0x51a   :  { %1384 = vmatprep.subr.mxu0 %v4762_v59  ;;  %v4799_v59 = vld [vmem:[#allocation13_spill] sm:$0xff] }
 0x51b   :  { %1385 = vmatpush2.msra.mxu0 %v4763_v60  ;;  %v4800_v60 = vld [vmem:[#allocation14_spill] sm:$0xff] }
 0x51c   :  { %1386 = vmatprep.subr.mxu0 %v4764_v61  ;;  %v4801_v61 = vld [vmem:[#allocation15_spill] sm:$0xff] }
 0x51d   :  { %1387 = vmatpush2.msra.mxu0 %v4765_v62  ;;  %v4802_v62 = vld [vmem:[#allocation16_spill] sm:$0xff] }
 0x51e   :  { %1388 = vmatprep.subr.mxu0 %v4766_v63  ;;  %v4803_v63 = vld [vmem:[#allocation17_spill] sm:$0xff] }
 0x51f   :  { %1389 = vmatpush2.msra.mxu0 %v4767_v0  ;;  %v4804_v0 = vld [vmem:[#allocation18_spill] sm:$0xff] }
 0x520   :  { %1390 = vmatprep.subr.mxu0 %v4768_v1  ;;  %v4805_v1 = vld [vmem:[#allocation19_spill] sm:$0xff] }
 0x521   :  { %1391 = vmatpush2.msra.mxu0 %v4769_v2  ;;  %v4806_v2 = vld [vmem:[#allocation20_spill] sm:$0xff] }
 0x522   :  { %1392 = vmatprep.subr.mxu0 %v4770_v3  ;;  %v4807_v3 = vld [vmem:[#allocation21_spill] sm:$0xff] }
 0x523   :  { %1393 = vmatpush2.msra.mxu0 %v4771_v5  ;;  %v4808_v5 = vld [vmem:[#allocation22_spill] sm:$0xff] }
 0x524   :  { %1394 = vmatprep.subr.mxu0 %v4772_v11  ;;  %v4809_v11 = vld [vmem:[#allocation23_spill] sm:$0xff] }
 0x525   :  { %1395 = vmatpush2.msra.mxu0 %v4773_v13  ;;  %v4810_v13 = vld [vmem:[#allocation24_spill] sm:$0xff] }
 0x526   :  { %1396 = vmatprep.subr.mxu0 %v4774_v16  ;;  %v4811_v16 = vld [vmem:[#allocation25_spill] sm:$0xff] }
 0x527   :  { %1397 = vmatpush2.msra.mxu0 %v4775_v18  ;;  %v4812_v18 = vld [vmem:[#allocation26_spill] sm:$0xff] }
 0x528   :  { %1398 = vmatprep.subr.mxu0 %v4776_v20  ;;  %v4813_v20 = vld [vmem:[#allocation27_spill] sm:$0xff] }
 0x529   :  { %1399 = vmatpush2.msra.mxu0 %v4777_v22  ;;  %v4814_v22 = vld [vmem:[#allocation28_spill] sm:$0xff] }
 0x52a   :  { %1400 = vmatprep.subr.mxu0 %v4778_v24  ;;  %v4815_v24 = vld [vmem:[#allocation29_spill] sm:$0xff] }
 0x52b   :  { %1401 = vmatpush2.msra.mxu0 %v4779_v26  ;;  %v4816_v26 = vld [vmem:[#allocation30_spill] sm:$0xff] }
 0x52c   :  { %1402 = vmatprep.subr.mxu0 %v4780_v28  ;;  %v4817_v28 = vld [vmem:[#allocation31_spill] sm:$0xff] }
 0x52d   :  { %1403 = vmatpush2.msra.mxu0 %v4781_v30  ;;  %v4818_v30 = vld [vmem:[#allocation33_spill] sm:$0xff] }
 0x52e   :  { %1404 = vmatprep.subr.mxu0 %v4782_v33  ;;  %v4819_v33 = vld [vmem:[#allocation35_spill] sm:$0xff] }
 0x52f   :  { %1405 = vmatpush2.msra.mxu0 %v4783_v35  ;;  %v4820_v35 = vld [vmem:[#allocation37_spill] sm:$0xff] }
 0x530   :  { %1406 = vmatprep.subr.mxu0 %v4784_v37  ;;  %v4821_v37 = vld [vmem:[#allocation39_spill] sm:$0xff] }
 0x531   :  { %1407 = vmatpush2.msra.mxu0 %v4785_v39  ;;  %v4822_v39 = vld [vmem:[#allocation41_spill] sm:$0xff] }
 0x532   :  { %1408 = vmatprep.subr.mxu0 %v4786_v41  ;;  %v4823_v41 = vld [vmem:[#allocation43_spill] sm:$0xff] }
 0x533   :  { %1409 = vmatpush2.msra.mxu0 %v4787_v43  ;;  %v4824_v43 = vld [vmem:[#allocation45_spill] sm:$0xff] }
 0x534   :  { %1410 = vmatprep.subr.mxu0 %v4788_v45  ;;  %v4825_v45 = vld [vmem:[#allocation47_spill] sm:$0xff] }
 0x535   :  { %1411 = vmatpush2.msra.mxu0 %v4789_v47  ;;  %v4826_v47 = vld [vmem:[#allocation49_spill] sm:$0xff] }
 0x536   :  { %1412 = vmatprep.subr.mxu0 %v4790_v49  ;;  %v4827_v49 = vld [vmem:[#allocation51_spill] sm:$0xff] }
 0x537   :  { %1413 = vmatpush2.msra.mxu0 %v4791_v51  ;;  %v4828_v51 = vld [vmem:[#allocation53_spill] sm:$0xff] }
 0x5aa   :  { %v3921_v53 = vpop.f32.mrf.mxu0 }
 0x5ac   :  { %v3923_v55 = vpop.f32.mrf.mxu0 }
 0x5b8   :  { %v2637_v25 = vpop.f32.mrf.mxu0 }
 0x5b9   :  { %v1132_v17 = vrot.slane %v2637_v25, 1 }
 0x5ba   :  { %v1108_v42 = vpop.f32.mrf.mxu0 }
 0x5bb   :  { %v1131_v29 = vrot.slane %v1108_v42, 1 }
 0x5bc   :  { %v2640_v38 = vpop.f32.mrf.mxu0 }
 0x5bd   :  { %v1136_v23 = vrot.slane %v2640_v38, 1  ;;  %v1133_v36 = vsel %vm326_vm3, %v1131_v29, %v1132_v17  ;;  %v4832_v29 = vld [vmem:[#allocation78_spill] sm:$0xff] }
 0x5be   :  { %v1118_v15 = vpop.f32.mrf.mxu0  ;;  %v1142_v52 = vmax.f32 %v1108_v42, %v1133_v36  ;;  %v1146_v56 = vmin.f32 %v1108_v42, %v1133_v36  ;;  %v4830_v42 = vld [vmem:[#allocation74_spill] sm:$0xff] }
 0x5bf   :  { %v1145_v46 = vmax.f32 %v2640_v38, %v1136_v23  ;;  %v1149_v34 = vmin.f32 %v2640_v38, %v1136_v23  ;;  %v1134_v19 = vrot.slane %v1118_v15, 1  ;;  %v4831_v38 = vld [vmem:[#allocation76_spill] sm:$0xff] }
 0x5c0   :  { %v1150_v32 = vsel %vm346_vm4, %v1142_v52, %v1146_v56 }
 0x5c1   :  { %v1137_v4 = vsel %vm326_vm3, %v1134_v19, %v1136_v23  ;;  %v1153_v31 = vsel %vm346_vm4, %v1145_v46, %v1149_v34  ;;  %v1135_v6 = vsel %vm326_vm3, %v1132_v17, %v1134_v19  ;;  %v4833_v23 = vld [vmem:[#allocation80_spill] sm:$0xff] }
 0x5c2   :  { %v1144_v40 = vmax.f32 %v1118_v15, %v1137_v4  ;;  %v1148_v48 = vmin.f32 %v1118_v15, %v1137_v4  ;;  %2641 = vmatprep.subr.msk.mxu1 %vm357_vm5, %v1153_v31  ;;  %v1143_v44 = vmax.f32 %v2637_v25, %v1135_v6  ;;  %v1147_v50 = vmin.f32 %v2637_v25, %v1135_v6  ;;  %v4829_v25 = vld [vmem:[#allocation72_spill] sm:$0xff] }
 0x5c3   :  { %2642 = vmatpush3.msk.msra.mxu1 %vm357_vm5, %v1153_v31 }
 0x5c4   :  { %v1152_v57 = vsel %vm346_vm4, %v1144_v40, %v1148_v48  ;;  %v1151_v12 = vsel %vm346_vm4, %v1143_v44, %v1147_v50 }
 0x5c5   :  { %2643 = vmatprep.subr.mxu1 %v1152_v57 }
 0x5c6   :  { %2644 = vmatpush3.msra.mxu1 %v1152_v57 }
 0x5c7   :  { %2645 = vmatprep.subr.mxu1 %v1151_v12 }
 0x5c8   :  { %2646 = vmatpush3.msra.mxu1 %v1151_v12 }
 0x5c9   :  { %2647 = vmatprep.subr.mxu1 %v1150_v32 }
 0x5ca   :  { %2648 = vmatpush3.msra.mxu1 %v1150_v32 }
 0x5cb   :  { %2650 = vmatmul.mubr.msk.f32.vlgmr.msra.gmra.mxu1 %vm215_vm1, %v2793_v14  ;;  %1427 = vmatprep.subr.mxu1 %v4792_v27 }
 0x5cc   :  { %1428 = vmatpush1.msra.mxu1 %v4793_v8 }
 0x5cd   :  { %1429 = vmatprep.subr.mxu1 %v4794_v9 }
 0x5ce   :  { %1430 = vmatpush1.msra.mxu1 %v4795_v7 }
 0x5cf   :  { %1431 = vmatprep.subr.mxu1 %v4796_v21 }
 0x5d0   :  { %1432 = vmatpush1.msra.mxu1 %v4797_v10 }
 0x5d1   :  { %1433 = vmatprep.subr.mxu1 %v4798_v58 }
 0x5d2   :  { %1434 = vmatpush1.msra.mxu1 %v4799_v59 }
 0x5d3   :  { %1435 = vmatprep.subr.mxu1 %v4800_v60 }
 0x5d4   :  { %1436 = vmatpush1.msra.mxu1 %v4801_v61 }
 0x5d5   :  { %1437 = vmatprep.subr.mxu1 %v4802_v62 }
 0x5d6   :  { %1438 = vmatpush1.msra.mxu1 %v4803_v63 }
 0x5d7   :  { %1439 = vmatprep.subr.mxu1 %v4804_v0  ;;  %v4835_v0 = vld [vmem:[#allocation68_spill] sm:$0xff] }
 0x5d8   :  { %1440 = vmatpush1.msra.mxu1 %v4805_v1 }
 0x5d9   :  { %1441 = vmatprep.subr.mxu1 %v4806_v2 }
 0x5da   :  { %1442 = vmatpush1.msra.mxu1 %v4807_v3  ;;  %v4836_v3 = vld [vmem:[#allocation69_spill] sm:$0xff] }
 0x5db   :  { %1443 = vmatprep.subr.mxu1 %v4808_v5 }
 0x5dc   :  { %1444 = vmatpush1.msra.mxu1 %v4809_v11 }
 0x5dd   :  { %1445 = vmatprep.subr.mxu1 %v4810_v13 }
 0x5de   :  { %1446 = vmatpush1.msra.mxu1 %v4811_v16 }
 0x5df   :  { %1447 = vmatprep.subr.mxu1 %v4812_v18 }
 0x5e0   :  { %1448 = vmatpush1.msra.mxu1 %v4813_v20 }
 0x5e1   :  { %1449 = vmatprep.subr.mxu1 %v4814_v22  ;;  %v4837_v22 = vld [vmem:[#allocation70_spill] sm:$0xff] }
 0x5e2   :  { %1450 = vmatpush1.msra.mxu1 %v4815_v24 }
 0x5e3   :  { %1451 = vmatprep.subr.mxu1 %v4816_v26 }
 0x5e4   :  { %1452 = vmatpush1.msra.mxu1 %v4817_v28 }
 0x5e5   :  { %1453 = vmatprep.subr.mxu1 %v4818_v30 }
 0x5e6   :  { %1454 = vmatpush1.msra.mxu1 %v4819_v33 }
 0x5e7   :  { %1455 = vmatprep.subr.mxu1 %v4820_v35 }
 0x5e8   :  { %1456 = vmatpush1.msra.mxu1 %v4821_v37 }
 0x5e9   :  { %1457 = vmatprep.subr.mxu1 %v4822_v39 }
 0x5ea   :  { %1458 = vmatpush1.msra.mxu1 %v4823_v41 }
 0x5eb   :  { %2403 = vmatprep.subr.msk.mxu1 %vm556_vm6, %v4824_v43 }
 0x5ec   :  { %2404 = vmatpush2.msk.msra.mxu1 %vm556_vm6, %v4825_v45 }
 0x5ed   :  { %1483 = vmatprep.subr.mxu1 %v4826_v47 }
 0x5ee   :  { %1484 = vmatpush2.msra.mxu1 %v4827_v49 }
 0x5ef   :  { %1485 = vmatprep.subr.mxu1 %v4828_v51 }
 0x5f0   :  { %1486 = vmatpush2.msra.mxu1 %v4829_v25 }
 0x5f1   :  { %1487 = vmatprep.subr.mxu1 %v4830_v42 }
 0x5f2   :  { %1488 = vmatpush2.msra.mxu1 %v4831_v38 }
 0x5f3   :  { %1489 = vmatprep.subr.mxu1 %v4832_v29 }
 0x5f4   :  { %1490 = vmatpush2.msra.mxu1 %v4833_v23 }
 0x68b   :  { %v2651_v15 = vpop.f32.mrf.mxu1 }
 0x68c   :  { %1236 = vrot.lane.b32.xlu1 %v2651_v15, %s2818_s17 }
 0x68d   :  { %v1223_v17 = vpop.f32.mrf.mxu1 }
 0x68e   :  { %1234 = vrot.lane.b32.xlu0 %v1223_v17, %s2818_s17  ;;  %s2829_s17 = smov 31  }
 0x690   :  { %1278 = vrot.lane.b32.xlu1 %v2651_v15, %s2819_s18 }
 0x692   :  { %1276 = vrot.lane.b32.xlu0 %v1223_v17, %s2819_s18  ;;  %s2830_s18 = smov 62  }
 0x694   :  { %1242 = vrot.lane.b32.xlu1 %v2651_v15, %s2820_s19 }
 0x696   :  { %1240 = vrot.lane.b32.xlu0 %v1223_v17, %s2820_s19  ;;  %s2831_s19 = smov 93  }
 0x698   :  { %1248 = vrot.lane.b32.xlu1 %v2651_v15, %s2821_s20 }
 0x69a   :  { %1246 = vrot.lane.b32.xlu0 %v1223_v17, %s2821_s20 }
 0x69c   :  { %1254 = vrot.lane.b32.xlu1 %v2651_v15, %s4834_s2 }
 0x69e   :  { %1252 = vrot.lane.b32.xlu0 %v1223_v17, %s4834_s2 }
 0x6a0   :  { %1260 = vrot.lane.b32.xlu1 %v2651_v15, %s2823_s23 }
 0x6a2   :  { %1258 = vrot.lane.b32.xlu0 %v1223_v17, %s2823_s23 }
 0x6fe   :  { %v1237_v46 = vpop.permute.xlu1 %1236 }
 0x6ff   :  { %v1265_v56 = vsel %vm346_vm4, %v2651_v15, %v1237_v46 }
 0x700   :  { %v1235_v34 = vpop.permute.xlu0 %1234 }
 0x701   :  { %v1264_v8 = vsel %vm346_vm4, %v1223_v17, %v1235_v34 }
 0x702   :  { %v1279_v19 = vpop.permute.xlu1 %1278 }
 0x703   :  { %v1283_v40 = vsel %vm346_vm4, %v1279_v19, %v2651_v15 }
 0x704   :  { %v1277_v36 = vpop.permute.xlu0 %1276  ;;  %v1285_v50 = vsel %vm470_vm7, %v1283_v40, %v1237_v46 }
 0x705   :  { %v1282_v44 = vsel %vm346_vm4, %v1277_v36, %v1223_v17  ;;  %vm4840_vm4 = vcmask 687104  }
 0x706   :  { %v1243_v4 = vpop.permute.xlu1 %1242  ;;  %v1284_v32 = vsel %vm470_vm7, %v1282_v44, %v1235_v34 }
 0x707   :  { %v1287_v57 = vsel %vm473_vm8, %v1285_v50, %v1243_v4  ;;  %v1267_v12 = vsel %vm470_vm7, %v1265_v56, %v1243_v4 }
 0x708   :  { %v1241_v31 = vpop.permute.xlu0 %1240 }
 0x709   :  { %v1286_v9 = vsel %vm473_vm8, %v1284_v32, %v1241_v31  ;;  %v1266_v10 = vsel %vm470_vm7, %v1264_v8, %v1241_v31 }
 0x70a   :  { %v1249_v6 = vpop.permute.xlu1 %1248 }
 0x70b   :  { %v1289_v14 = vsel %vm476_vm9, %v1287_v57, %v1249_v6  ;;  %v1269_v7 = vsel %vm473_vm8, %v1267_v12, %v1249_v6 }
 0x70c   :  { %v1247_v48 = vpop.permute.xlu0 %1246 }
 0x70d   :  { %v1288_v58 = vsel %vm476_vm9, %v1286_v9, %v1247_v48  ;;  %v1268_v61 = vsel %vm473_vm8, %v1266_v10, %v1247_v48  ;;  %vm4842_vm8 = vmmov %vm4840_vm4 }
 0x70e   :  { %v1255_v52 = vpop.permute.xlu1 %1254 }
 0x70f   :  { %v1291_v21 = vsel %vm479_vm10, %v1289_v14, %v1255_v52  ;;  %v1271_v59 = vsel %vm476_vm9, %v1269_v7, %v1255_v52  ;;  %v4843_v14 = vmov 0.0  }
 0x710   :  { %v1253_v27 = vpop.permute.xlu0 %1252  ;;  %v1293_v1 = vmul.f32 %v4835_v0, %v1291_v21 }
 0x711   :  { %v1290_v62 = vsel %vm479_vm10, %v1288_v58, %v1253_v27  ;;  %v1270_v2 = vsel %vm476_vm9, %v1268_v61, %v1253_v27  ;;  %v4844_v58 = vld [vmem:[#allocation83_spill] sm:$0xff]  ;;  %vm4846_vm9 = vcmask 1039360  }
 0x712   :  { %v1261_v60 = vpop.permute.xlu1 %1260  ;;  %v1292_v16 = vmul.f32 %v4835_v0, %v1290_v62 }
 0x713   :  { %v1273_v63 = vsel %vm479_vm10, %v1271_v59, %v1261_v60 }
 0x714   :  { %v1275_v5 = vmul.f32 %v4836_v3, %v1273_v63  ;;  %v1259_v11 = vpop.permute.xlu0 %1258  ;;  %v4845_v63 = vld [vmem:[#allocation84_spill] sm:$0xff] }
 0x715   :  { %v1272_v13 = vsel %vm479_vm10, %v1270_v2, %v1259_v11  ;;  %vm4847_vm10 = vmmov %vm4846_vm9 }
 0x716   :  { %v1295_v18 = vadd.f32 %v1293_v1, %v1275_v5  ;;  %v1274_v20 = vmul.f32 %v4836_v3, %v1272_v13 }
 0x718   :  { %v1297_v24 = vadd.f32 %v4837_v22, %v1295_v18  ;;  %v1294_v26 = vadd.f32 %v1292_v16, %v1274_v20 }
 0x71a   :  { %2767 = vtanh.f32 %v1297_v24  ;;  %v1296_v28 = vadd.f32 %v4837_v22, %v1294_v26 }
 0x71c   :  { %2769 = vtanh.f32 %v1296_v28 }
 0x71d   :  { %2771 = vtanh.f32 %v3921_v53 }
 0x71e   :  { %2773 = vtanh.f32 %v3923_v55 }
 0x727   :  { %v2768_v30 = vpop.eup %2767 }
 0x728   :  { %v1312_v37 = vrot.slane %v2768_v30, 2  ;;  %v1303_v41 = vrot.slane %v2768_v30, 1  ;;  %v1330_v42 = vrot.slane %v2768_v30, 4  ;;  %v1321_v38 = vrot.slane %v2768_v30, 3 }
 0x729   :  { %v2770_v33 = vpop.eup %2769 }
 0x72a   :  { %v1311_v35 = vrot.slane %v2770_v33, 2  ;;  %v1302_v39 = vrot.slane %v2770_v33, 1  ;;  %v1329_v51 = vrot.slane %v2770_v33, 4  ;;  %v1320_v25 = vrot.slane %v2770_v33, 3  ;;  %v4049_v55 = vpop.eup %2771 }
 0x72b   :  { %v2774_v11 = vpop.eup %2773  ;;  %v881_v13 = vrot.slane %v4049_v55, 1  ;;  %v891_v18 = vrot.slane %v4049_v55, 2  ;;  %v901_v22 = vrot.slane %v4049_v55, 3  ;;  %v911_v26 = vrot.slane %v4049_v55, 4 }
 0x72c   :  { %v1313_v43 = vsel %vm233_vm0, %v1311_v35, %v1312_v37  ;;  %v1304_v45 = vsel %vm326_vm3, %v1302_v39, %v1303_v41  ;;  %v1331_v29 = vsel %vm556_vm6, %v1329_v51, %v1330_v42  ;;  %v1322_v23 = vsel %vm4838_vm2, %v1320_v25, %v1321_v38 }
 0x72d   :  { %v2756_v47 = vpack.i.bf16 %v1312_v37, %v1313_v43  ;;  %v2751_v49 = vpack.i.bf16 %v1303_v41, %v1304_v45  ;;  %vm4839_vm0 = vcmask 1014784   ;;  %v882_v16 = vrot.slane %v2774_v11, 1 }
 0x72e   :  { %vm4841_vm7 = vmmov %vm4839_vm0  ;;  %v892_v20 = vrot.slane %v2774_v11, 2  ;;  %v902_v24 = vrot.slane %v2774_v11, 3  ;;  %v912_v28 = vrot.slane %v2774_v11, 4 }
 0x72f   :  { %2757 = vrot.lane.b32.xlu1 %v2756_v47, %s2824_s7  ;;  %2752 = vrot.lane.b32.xlu0 %v2751_v49, %s2825_s26  ;;  %vm4854_vm2 = vmmov %vm4839_vm0 }
 0x733   :  { %1332 = vrot.lane.b32.xlu1 %v1331_v29, %s2826_s28  ;;  %1323 = vrot.lane.b32.xlu0 %v1322_v23, %s2827_s6 }
 0x737   :  { %1334 = vrot.lane.b32.xlu1 %v1330_v42, %s2826_s28  ;;  %1325 = vrot.lane.b32.xlu0 %v1321_v38, %s2827_s6 }
 0x7a1   :  { %v2758_v15 = vpop.permute.xlu1 %2757  ;;  %v2753_v17 = vpop.permute.xlu0 %2752 }
 0x7a2   :  { %v2759_v46 = vunpack.i.l.bf16 %v2758_v15  ;;  %v2754_v34 = vunpack.i.l.bf16 %v2753_v17  ;;  %v2760_v36 = vunpack.i.h.bf16 %v2758_v15  ;;  %v2755_v4 = vunpack.i.h.bf16 %v2753_v17 }
 0x7a4   :  { %v1340_v19 = vsel %vm569_vm12, %v2754_v34, %v2759_v46  ;;  %v1338_v44 = vsel %vm4840_vm4, %v2770_v33, %v2754_v34  ;;  %v1341_v56 = vsel %vm569_vm12, %v2755_v4, %v2760_v36  ;;  %v1339_v32 = vsel %vm4842_vm8, %v2768_v30, %v2755_v4 }
 0x7a5   :  { %v1333_v31 = vpop.permute.xlu1 %1332  ;;  %v1324_v6 = vpop.permute.xlu0 %1323  ;;  %v2832_v34 = vmov 1966171168   ;;  %vm887_vm12 = vcmask 252928  }
 0x7a6   :  { %v1344_v40 = vsel %vm575_vm13, %v1324_v6, %v1333_v31  ;;  %2405 = vmatprep.mubr.msk.f32.mxu1 %vm589_vm14, %v1333_v31  ;;  %v1342_v48 = vsel %vm4839_vm0, %v1340_v19, %v1324_v6  ;;  %v931_v19 = vunpack.c.l.s4 %v2832_v34  ;;  %v1731_v34 = vld [vmem:[%s4581_s9 + $0x50] sm:$0xff] }
 0x7a7   :  { %1414 = vmatprep.mubr.f32.mxu0 %v1342_v48  ;;  %1492 = vmatmul.mubr.f32.vlgmr.msra.gmra.mxu1 %v1344_v40 }
 0x7a8   :  { %1415 = vmatmul.mubr.f32.vlgmr.msra.gmra.mxu0 %v1338_v44 }
 0x7a9   :  { %v1335_v50 = vpop.permute.xlu1 %1334  ;;  %v1326_v52 = vpop.permute.xlu0 %1325 }
 0x7aa   :  { %2406 = vmatprep.mubr.msk.f32.mxu1 %vm589_vm14, %v1335_v50  ;;  %v1343_v57 = vsel %vm4841_vm7, %v1341_v56, %v1326_v52  ;;  %v1345_v12 = vsel %vm575_vm13, %v1326_v52, %v1335_v50  ;;  %vm897_vm13 = vcmask 506880   ;;  %vm907_vm14 = vcmask 760832  }
 0x7ab   :  { %1420 = vmatprep.mubr.f32.mxu0 %v1343_v57  ;;  %1498 = vmatmul.mubr.f32.gmra.mxu1 %v1345_v12  ;;  %v932_v50 = vunpack.c.0.s8 %v931_v19  ;;  %v1764_v19 = vld [vmem:[%s4581_s9 + $0x158] sm:$0xff] }
 0x7ac   :  { %1421 = vmatmul.mubr.f32.gmra.mxu0 %v1339_v32  ;;  %1614 = vmatprep.mubr.f32.mxu1 %v4843_v14 }
 0x867   :  { %v1493_v27 = vpop.f32.mrf.mxu1 }
 0x868   :  { %v1416_v8 = vpop.f32.mrf.mxu0 }
 0x869   :  { %v1495_v9 = vpop.f32.mrf.mxu1  ;;  %v1417_v61 = vadd.f32 %v1416_v8, %v4844_v58  ;;  %v4848_v8 = vld [vmem:[#allocation82_spill] sm:$0xff] }
 0x86a   :  { %v1418_v7 = vpop.f32.mrf.mxu0 }
 0x86b   :  { %v1499_v21 = vpop.f32.mrf.mxu1  ;;  %v1419_v2 = vadd.f32 %v1418_v7, %v4845_v63  ;;  %v1494_v3 = vadd.f32 %v1493_v27, %v1417_v61 }
 0x86c   :  { %v1422_v10 = vpop.f32.mrf.mxu0 }
 0x86d   :  { %v1423_v59 = vadd.f32 %v1422_v10, %v4844_v58  ;;  %v1501_v1 = vpop.f32.mrf.mxu1  ;;  %v1496_v5 = vadd.f32 %v1495_v9, %v1419_v2  ;;  %v4079_v9 = vsub.s32 %v932_v50, %v4848_v8  ;;  %v1778_v50 = vld [vmem:[%s4581_s9 + $0x1c8] sm:$0xff] }
 0x86e   :  { %v1424_v60 = vpop.f32.mrf.mxu0 }
 0x86f   :  { %v1500_v62 = vadd.f32 %v1499_v21, %v1423_v59  ;;  %v1425_v0 = vadd.f32 %v1424_v60, %v4845_v63 }
 0x871   :  { %v1502_v53 = vadd.f32 %v1501_v1, %v1425_v0  ;;  %1512 = vrot.lane.b32.xlu0 %v1500_v62, %s2816_s22 }
 0x873   :  { %1514 = vrot.lane.b32.xlu1 %v1502_v53, %s2816_s22 }
 0x875   :  { %1508 = vrot.lane.b32.xlu0 %v1494_v3, %s2816_s22 }
 0x877   :  { %1510 = vrot.lane.b32.xlu1 %v1496_v5, %s2816_s22 }
 0x879   :  { %883 = vrot.lane.b32.xlu0 %v881_v13, %s2829_s17 }
 0x87b   :  { %885 = vrot.lane.b32.xlu1 %v882_v16, %s2829_s17 }
 0x87d   :  { %893 = vrot.lane.b32.xlu0 %v891_v18, %s2830_s18  ;;  %v1752_v18 = vld [vmem:[%s4581_s9 + $0xf8] sm:$0xff] }
 0x87f   :  { %895 = vrot.lane.b32.xlu1 %v892_v20, %s2830_s18  ;;  %v1736_v20 = vld [vmem:[%s4581_s9 + $0x78] sm:$0xff] }
 0x881   :  { %903 = vrot.lane.b32.xlu0 %v901_v22, %s2831_s19  ;;  %v1751_v22 = vld [vmem:[%s4581_s9 + $0xf0] sm:$0xff] }
 0x883   :  { %905 = vrot.lane.b32.xlu1 %v902_v24, %s2831_s19  ;;  %v1784_v24 = vld [vmem:[%s4581_s9 + $0x1f8] sm:$0xff] }
 0x884   :  { %2487 = vmatprep.subr.mxu0 %v1784_v24  ;;  %v1756_v24 = vld [vmem:[%s4581_s9 + $0x118] sm:$0xff] }
 0x885   :  { %913 = vrot.lane.b32.xlu0 %v911_v26, %s2827_s6  ;;  %v1735_v26 = vld [vmem:[%s4581_s9 + $0x70] sm:$0xff] }
 0x887   :  { %915 = vrot.lane.b32.xlu1 %v912_v28, %s2827_s6  ;;  %v1768_v28 = vld [vmem:[%s4581_s9 + $0x178] sm:$0xff] }
 0x888   :  { %2488 = vmatpush3.msra.mxu0 %v1768_v28  ;;  %v1771_v28 = vld [vmem:[%s4581_s9 + $0x190] sm:$0xff] }
 0x8e3   :  { %v1513_v30 = vpop.permute.xlu0 %1512 }
 0x8e5   :  { %v1515_v33 = vpop.permute.xlu1 %1514 }
 0x8e6   :  { %v1517_v35 = vsel %vm4846_vm9, %v1513_v30, %v1515_v33  ;;  %v1525_v37 = vmax.f32 %v1502_v53, %v1515_v33  ;;  %v1750_v30 = vld [vmem:[%s4581_s9 + $0xe8] sm:$0xff]  ;;  %v1783_v33 = vld [vmem:[%s4581_s9 + $0x1f0] sm:$0xff] }
 0x8e7   :  { %v1524_v39 = vmax.f32 %v1500_v62, %v1517_v35  ;;  %v1509_v41 = vpop.permute.xlu0 %1508  ;;  %2489 = vmatprep.subr.mxu0 %v1783_v33  ;;  %v1755_v33 = vld [vmem:[%s4581_s9 + $0x110] sm:$0xff] }
 0x8e8   :  { %v1534_v43 = vrot.slane %v1525_v37, 1 }
 0x8e9   :  { %v1531_v45 = vrot.slane %v1524_v39, 1  ;;  %v1511_v47 = vpop.permute.xlu1 %1510 }
 0x8ea   :  { %v1543_v49 = vmax.f32 %v1525_v37, %v1534_v43  ;;  %v1516_v51 = vsel %vm4847_vm10, %v1509_v41, %v1511_v47  ;;  %v1523_v25 = vmax.f32 %v1496_v5, %v1511_v47  ;;  %v1734_v37 = vld [vmem:[%s4581_s9 + $0x68] sm:$0xff]  ;;  %v1815_v5 = vld [vmem:[%s4581_s9 + $0x2f0] sm:$0xff] }
 0x8eb   :  { %v1542_v42 = vmax.f32 %v1524_v39, %v1531_v45  ;;  %v1522_v38 = vmax.f32 %v1494_v3, %v1516_v51  ;;  %v884_v29 = vpop.permute.xlu0 %883  ;;  %v1767_v39 = vld [vmem:[%s4581_s9 + $0x170] sm:$0xff]  ;;  %v1766_v51 = vld [vmem:[%s4581_s9 + $0x168] sm:$0xff] }
 0x8ec   :  { %v1533_v23 = vrot.slane %v1523_v25, 1  ;;  %2407 = vmatprep.subr.msk.mxu1 %vm799_vm15, %v1543_v49  ;;  %v919_v56 = vsel %vm887_vm12, %v2774_v11, %v884_v29  ;;  %2490 = vmatpush3.msra.mxu0 %v1767_v39  ;;  %v1733_v49 = vld [vmem:[%s4581_s9 + $0x60] sm:$0xff]  ;;  %v1770_v39 = vld [vmem:[%s4581_s9 + $0x188] sm:$0xff] }
 0x8ed   :  { %v1530_v15 = vrot.slane %v1522_v38, 1  ;;  %2408 = vmatpush1.msk.msra.mxu1 %vm799_vm15, %v1542_v42  ;;  %v886_v17 = vpop.permute.xlu1 %885  ;;  %v927_v7 = vcombine.low %v4049_v55, %v919_v56  ;;  %v4851_v55 = vlaneseq  ;;  %v1748_v42 = vld [vmem:[%s4581_s9 + $0xd8] sm:$0xff]  ;;  %v1729_v56 = vld [vmem:[%s4581_s9 + $0x40] sm:$0xff] }
 0x8ee   :  { %v1535_v46 = vsel %vm326_vm3, %v1533_v23, %v1534_v43  ;;  %v888_v40 = vsel %vm887_vm12, %v884_v29, %v886_v17  ;;  %v1749_v43 = vld [vmem:[%s4581_s9 + $0xe0] sm:$0xff]  ;;  %v1732_v29 = vld [vmem:[%s4581_s9 + $0x58] sm:$0xff]  ;;  %v1747_v17 = vld [vmem:[%s4581_s9 + $0xd0] sm:$0xff] }
 0x8ef   :  { %v1532_v36 = vsel %vm326_vm3, %v1530_v15, %v1531_v45  ;;  %v1541_v4 = vmax.f32 %v1523_v25, %v1535_v46  ;;  %v894_v31 = vpop.permute.xlu0 %893  ;;  %vm4849_vm3 = vmmov %vm4839_vm0  ;;  %v936_v61 = vrot.slane %v927_v7, %v4079_v9  ;;  %vm4092_vm15 = vcmp.lt.s32.totalorder %v4851_v55, 795  ;;  %v1782_v45 = vld [vmem:[%s4581_s9 + $0x1e8] sm:$0xff]  ;;  %v1765_v23 = vld [vmem:[%s4581_s9 + $0x160] sm:$0xff] }
 0x8f0   :  { %v1540_v6 = vmax.f32 %v1522_v38, %v1532_v36  ;;  %v920_v57 = vsel %vm897_vm13, %v888_v40, %v894_v31  ;;  %2491 = vmatprep.subr.mxu0 %v1782_v45  ;;  %v1781_v38 = vld [vmem:[%s4581_s9 + $0x1e0] sm:$0xff]  ;;  %v1780_v46 = vld [vmem:[%s4581_s9 + $0x1d8] sm:$0xff] }
 0x8f1   :  { %1580 = vmatprep.subr.mxu1 %v1541_v4  ;;  %v896_v48 = vpop.permute.xlu1 %895  ;;  %2492 = vmatpush3.msra.mxu0 %v1766_v51  ;;  %v1746_v4 = vld [vmem:[%s4581_s9 + $0xc8] sm:$0xff]  ;;  %v1728_v7 = vld [vmem:[%s4581_s9 + $0x38] sm:$0xff]  ;;  %v1769_v45 = vld [vmem:[%s4581_s9 + $0x180] sm:$0xff] }
 0x8f2   :  { %v898_v44 = vsel %vm897_vm13, %v894_v31, %v896_v48  ;;  %1581 = vmatpush1.msra.mxu1 %v1540_v6  ;;  %2493 = vmatprep.subr.mxu0 %v1781_v38  ;;  %v1779_v31 = vld [vmem:[%s4581_s9 + $0x1d0] sm:$0xff]  ;;  %v1730_v6 = vld [vmem:[%s4581_s9 + $0x48] sm:$0xff]  ;;  %v1740_v55 = vld [vmem:[%s4581_s9 + $0x98] sm:$0xff] }
 0x8f3   :  { %2409 = vmatmul.mubr.msk.f32.vlgmr.msra.gmra.mxu1 %vm795_vm11, %v3814_v54  ;;  %v904_v52 = vpop.permute.xlu0 %903  ;;  %vm4850_vm11 = vmmov %vm4839_vm0  ;;  %2452 = vmatprep.subr.mxu1 %v1752_v18  ;;  %v1763_v48 = vld [vmem:[%s4581_s9 + $0x150] sm:$0xff]  ;;  %v1753_v51 = vld [vmem:[%s4581_s9 + $0x100] sm:$0xff] }
 0x8f4   :  { %v921_v12 = vsel %vm907_vm14, %v898_v44, %v904_v52  ;;  %2453 = vmatpush3.msra.mxu1 %v1736_v20  ;;  %2494 = vmatpush3.msra.mxu0 %v1765_v23  ;;  %v1745_v44 = vld [vmem:[%s4581_s9 + $0xc0] sm:$0xff]  ;;  %v1739_v18 = vld [vmem:[%s4581_s9 + $0x90] sm:$0xff]  ;;  %v1772_v20 = vld [vmem:[%s4581_s9 + $0x198] sm:$0xff] }
 0x8f5   :  { %v928_v32 = vcombine.low %v920_v57, %v921_v12  ;;  %v906_v27 = vpop.permute.xlu1 %905  ;;  %2454 = vmatprep.subr.mxu1 %v1751_v22  ;;  %2495 = vmatprep.subr.mxu0 %v1780_v46  ;;  %v1762_v57 = vld [vmem:[%s4581_s9 + $0x148] sm:$0xff]  ;;  %v1744_v12 = vld [vmem:[%s4581_s9 + $0xb8] sm:$0xff]  ;;  %v1723_v22 = vld [vmem:[%s4581_s9 + $0x10] sm:$0xff] }
 0x8f6   :  { %v908_v21 = vsel %vm907_vm14, %v904_v52, %v906_v27  ;;  %2455 = vmatpush3.msra.mxu1 %v1735_v26  ;;  %2496 = vmatpush3.msra.mxu0 %v1764_v19  ;;  %v1777_v27 = vld [vmem:[%s4581_s9 + $0x1c0] sm:$0xff]  ;;  %v1738_v26 = vld [vmem:[%s4581_s9 + $0x88] sm:$0xff] }
 0x8f7   :  { %v914_v10 = vpop.permute.xlu0 %913  ;;  %v943_v58 = vrot.slane %v928_v32, %v4079_v9  ;;  %2456 = vmatprep.subr.mxu1 %v1750_v30  ;;  %2497 = vmatprep.subr.mxu0 %v1779_v31  ;;  %v1722_v30 = vld [vmem:[%s4581_s9 + $0x8] sm:$0xff] }
 0x8f8   :  { %v922_v59 = vsel %vm4849_vm3, %v908_v21, %v914_v10  ;;  %2457 = vmatpush3.msra.mxu1 %v1734_v37  ;;  %2498 = vmatpush3.msra.mxu0 %v1763_v48  ;;  %v1761_v21 = vld [vmem:[%s4581_s9 + $0x140] sm:$0xff] }
 0x8f9   :  { %v916_v54 = vpop.permute.xlu1 %915  ;;  %v958_v63 = vcombine.low %v936_v61, %v943_v58  ;;  %2458 = vmatprep.subr.mxu1 %v1749_v43  ;;  %2499 = vmatprep.subr.mxu0 %v1778_v50  ;;  %v1743_v58 = vld [vmem:[%s4581_s9 + $0xb0] sm:$0xff]  ;;  %v1742_v61 = vld [vmem:[%s4581_s9 + $0xa8] sm:$0xff]  ;;  %v1737_v37 = vld [vmem:[%s4581_s9 + $0x80] sm:$0xff] }
 0x8fa   :  { %v917_v60 = vsel %vm4850_vm11, %v914_v10, %v916_v54  ;;  %v957_v1 = vrot.slane %v916_v54, %v4079_v9  ;;  %2459 = vmatpush3.msra.mxu1 %v1733_v49  ;;  %2500 = vmatpush3.msra.mxu0 %v1762_v57  ;;  %v1776_v54 = vld [vmem:[%s4581_s9 + $0x1b8] sm:$0xff]  ;;  %v1754_v43 = vld [vmem:[%s4581_s9 + $0x108] sm:$0xff] }
 0x8fb   :  { %v929_v62 = vcombine.low %v922_v59, %v917_v60  ;;  %v966_v53 = vrot.slane %v958_v63, %v4079_v9  ;;  %2460 = vmatprep.subr.mxu1 %v1748_v42  ;;  %2501 = vmatprep.subr.mxu0 %v1777_v27  ;;  %v1727_v59 = vld [vmem:[%s4581_s9 + $0x30] sm:$0xff]  ;;  %v1760_v60 = vld [vmem:[%s4581_s9 + $0x138] sm:$0xff]  ;;  %v1726_v63 = vld [vmem:[%s4581_s9 + $0x28] sm:$0xff] }
 0x8fc   :  { %2461 = vmatpush3.msra.mxu1 %v1732_v29  ;;  %2502 = vmatpush3.msra.mxu0 %v1761_v21  ;;  %v1816_v49 = vld [vmem:[%s4581_s9 + $0x2f8] sm:$0xff]  ;;  %v2833_v21 = vmov 1983009808  }
 0x8fd   :  { %v950_v0 = vrot.slane %v929_v62, %v4079_v9  ;;  %2462 = vmatprep.subr.mxu1 %v1747_v17  ;;  %v1775_v62 = vld [vmem:[%s4581_s9 + $0x1b0] sm:$0xff]  ;;  %2503 = vmatprep.subr.mxu0 %v1776_v54 }
 0x8fe   :  { %2463 = vmatpush3.msra.mxu1 %v1731_v34  ;;  %2504 = vmatpush3.msra.mxu0 %v1760_v60 }
 0x8ff   :  { %v959_v2 = vcombine.low %v950_v0, %v957_v1  ;;  %2464 = vmatprep.subr.mxu1 %v1746_v4  ;;  %v1759_v0 = vld [vmem:[%s4581_s9 + $0x130] sm:$0xff]  ;;  %v1741_v1 = vld [vmem:[%s4581_s9 + $0xa0] sm:$0xff]  ;;  %2505 = vmatprep.subr.mxu0 %v1775_v62 }
 0x900   :  { %2465 = vmatpush3.msra.mxu1 %v1730_v6  ;;  %2506 = vmatpush3.msra.mxu0 %v1759_v0 }
 0x901   :  { %v973_v3 = vrot.slane %v959_v2, %v4079_v9  ;;  %2466 = vmatprep.subr.mxu1 %v1745_v44  ;;  %v1774_v2 = vld [vmem:[%s4581_s9 + $0x1a8] sm:$0xff] }
 0x902   :  { %2467 = vmatpush3.msra.mxu1 %v1729_v56  ;;  %2507 = vmatprep.subr.mxu0 %v1774_v2 }
 0x903   :  { %v974_v11 = vcombine.low %v966_v53, %v973_v3  ;;  %2468 = vmatprep.subr.mxu1 %v1744_v12  ;;  %v1725_v53 = vld [vmem:[%s4581_s9 + $0x20] sm:$0xff]  ;;  %v1758_v3 = vld [vmem:[%s4581_s9 + $0x128] sm:$0xff] }
 0x904   :  { %2469 = vmatpush3.msra.mxu1 %v1728_v7  ;;  %2508 = vmatpush3.msra.mxu0 %v1758_v3  ;;  %v1799_v3 = vld [vmem:[%s4581_s9 + $0x270] sm:$0xff] }
 0x905   :  { %980 = vst.msk [vmem:[#allocation2] ss:$2 sm:$0x7f] %vm4092_vm15, %v974_v11  ;;  %2470 = vmatprep.subr.mxu1 %v1743_v58  ;;  %v1773_v11 = vld [vmem:[%s4581_s9 + $0x1a0] sm:$0xff] }
 0x906   :  { %2471 = vmatpush3.msra.mxu1 %v1727_v59  ;;  %2509 = vmatprep.subr.mxu0 %v1773_v11  ;;  %v1814_v11 = vld [vmem:[%s4581_s9 + $0x2e8] sm:$0xff] }
 0x907   :  { %2472 = vmatprep.subr.mxu1 %v1742_v61 }
 0x908   :  { %2473 = vmatpush3.msra.mxu1 %v1726_v63 }
 0x909   :  { %2474 = vmatprep.subr.mxu1 %v1741_v1 }
 0x90a   :  { %2475 = vmatpush3.msra.mxu1 %v1725_v53 }
 0x90b   :  { %2476 = vmatprep.subr.mxu1 %v1740_v55  ;;  %v1820_v55 = vld [vmem:[%s4581_s9 + $0x318] sm:$0x7] }
 0x9b3   :  { %v1616_v13 = vpop.f32.mrf.mxu1 }
 0x9b4   :  { %2775 = vtanh.f32 %v1616_v13  ;;  %v1724_v13 = vld [vmem:[%s4581_s9 + $0x18] sm:$0xff] }
 0x9b5   :  { %v1618_v16 = vpop.f32.mrf.mxu1  ;;  %2477 = vmatpush3.msra.mxu1 %v1724_v13  ;;  %v1798_v13 = vld [vmem:[%s4581_s9 + $0x268] sm:$0xff] }
 0x9b6   :  { %2777 = vtanh.f32 %v1618_v16  ;;  %v1757_v16 = vld [vmem:[%s4581_s9 + $0x120] sm:$0xff]  ;;  %2478 = vmatprep.subr.mxu1 %v1739_v18 }
 0x9b7   :  { %2510 = vmatpush3.msra.mxu0 %v1757_v16  ;;  %2479 = vmatpush3.msra.mxu1 %v1723_v22  ;;  %v1819_v16 = vld [vmem:[%s4581_s9 + $0x310] sm:$0xff]  ;;  %v1813_v18 = vld [vmem:[%s4581_s9 + $0x2e0] sm:$0xff] }
 0x9b8   :  { %2511 = vmatprep.subr.mxu0 %v1772_v20  ;;  %2480 = vmatprep.subr.mxu1 %v1738_v26  ;;  %v1797_v20 = vld [vmem:[%s4581_s9 + $0x260] sm:$0xff]  ;;  %v1812_v26 = vld [vmem:[%s4581_s9 + $0x2d8] sm:$0xff] }
 0x9b9   :  { %2512 = vmatpush3.msra.mxu0 %v1756_v24  ;;  %2481 = vmatpush3.msra.mxu1 %v1722_v30  ;;  %v1818_v24 = vld [vmem:[%s4581_s9 + $0x308] sm:$0xff]  ;;  %v1817_v30 = vld [vmem:[%s4581_s9 + $0x300] sm:$0xff] }
 0x9ba   :  { %2513 = vmatprep.subr.mxu0 %v1771_v28  ;;  %2482 = vmatprep.subr.mxu1 %v1737_v37  ;;  %v1796_v28 = vld [vmem:[%s4581_s9 + $0x258] sm:$0xff] }
 0x9bb   :  { %2514 = vmatpush3.msra.mxu0 %v1755_v33  ;;  %v1811_v33 = vld [vmem:[%s4581_s9 + $0x2d0] sm:$0xff] }
 0x9bc   :  { %2515 = vmatprep.subr.mxu0 %v1770_v39  ;;  %v1795_v39 = vld [vmem:[%s4581_s9 + $0x250] sm:$0xff] }
 0x9bd   :  { %2516 = vmatpush3.msra.mxu0 %v1754_v43  ;;  %v1794_v43 = vld [vmem:[%s4581_s9 + $0x248] sm:$0xff] }
 0x9be   :  { %2517 = vmatprep.subr.mxu0 %v1769_v45  ;;  %v1809_v45 = vld [vmem:[%s4581_s9 + $0x2c0] sm:$0xff] }
 0x9bf   :  { %2518 = vmatpush3.msra.mxu0 %v1753_v51  ;;  %v1808_v51 = vld [vmem:[%s4581_s9 + $0x2b8] sm:$0xff] }
 0x9c0   :  { %2652 = vmatprep.subr.mxu0 %v4843_v14 }
 0x9c1   :  { %v4122_v35 = vpop.eup %2775 }
 0x9c2   :  { %v1625_v41 = vrot.slane %v4122_v35, 1  ;;  %v1634_v15 = vrot.slane %v4122_v35, 2  ;;  %v1643_v40 = vrot.slane %v4122_v35, 3  ;;  %v1652_v32 = vrot.slane %v4122_v35, 4 }
 0x9c3   :  { %v4137_v47 = vpop.eup %2777 }
 0x9c4   :  { %1627 = vrot.lane.b32.xlu0 %v1625_v41, %s2829_s17  ;;  %v1626_v25 = vrot.slane %v4137_v47, 1  ;;  %v1635_v36 = vrot.slane %v4137_v47, 2  ;;  %v1644_v52 = vrot.slane %v4137_v47, 3  ;;  %v1653_v10 = vrot.slane %v4137_v47, 4  ;;  %v1721_v41 = vld [vmem:[%s4581_s9] sm:$0xff] }
 0x9c5   :  { %2483 = vmatpush3.msra.mxu1 %v1721_v41  ;;  %v1810_v41 = vld [vmem:[%s4581_s9 + $0x2c8] sm:$0xff] }
 0x9c6   :  { %1629 = vrot.lane.b32.xlu1 %v1626_v25, %s2829_s17  ;;  %2522 = vmatprep.subr.mxu1 %v1816_v49  ;;  %v1793_v49 = vld [vmem:[%s4581_s9 + $0x240] sm:$0xff] }
 0x9c8   :  { %1636 = vrot.lane.b32.xlu0 %v1634_v15, %s2830_s18 }
 0x9ca   :  { %1638 = vrot.lane.b32.xlu1 %v1635_v36, %s2830_s18 }
 0x9cc   :  { %1645 = vrot.lane.b32.xlu0 %v1643_v40, %s2831_s19 }
 0x9ce   :  { %1647 = vrot.lane.b32.xlu1 %v1644_v52, %s2831_s19 }
 0x9d0   :  { %1654 = vrot.lane.b32.xlu0 %v1652_v32, %s2827_s6 }
 0x9d2   :  { %1656 = vrot.lane.b32.xlu1 %v1653_v10, %s2827_s6  ;;  %v1832_v10 = vunpack.c.l.s4 %v2833_v21  ;;  %v2157_v21 = vld [vmem:[%s4583_s11 + $0x10] sm:$0xff] }
 0x9d4   :  { %v1833_v54 = vunpack.c.0.s8 %v1832_v10  ;;  %v2156_v10 = vld [vmem:[%s4583_s11 + $0x8] sm:$0xff] }
 0x9d6   :  { %v1836_v59 = vsub.s32 %v1833_v54, %v4848_v8  ;;  %v2262_v54 = vld [vmem:[%s4585_s13 + $0x50] sm:$0xf] }
 0xa36   :  { %v1628_v25 = vpop.permute.xlu0 %1627 }
 0xa37   :  { %v1660_v46 = vsel %vm887_vm12, %v4137_v47, %v1628_v25 }
 0xa38   :  { %v1630_v42 = vpop.permute.xlu1 %1629  ;;  %v1668_v31 = vcombine.low %v4122_v35, %v1660_v46  ;;  %v1804_v46 = vld [vmem:[%s4581_s9 + $0x298] sm:$0xff] }
 0xa39   :  { %v1631_v29 = vsel %vm887_vm12, %v1628_v25, %v1630_v42  ;;  %v1792_v25 = vld [vmem:[%s4581_s9 + $0x238] sm:$0xff]  ;;  %v1807_v42 = vld [vmem:[%s4581_s9 + $0x2b0] sm:$0xff] }
 0xa3a   :  { %v1637_v38 = vpop.permute.xlu0 %1636  ;;  %v1677_v47 = vrot.slane %v1668_v31, %v4079_v9  ;;  %v1786_v31 = vld [vmem:[%s4581_s9 + $0x208] sm:$0xff] }
 0xa3b   :  { %v1661_v34 = vsel %vm897_vm13, %v1631_v29, %v1637_v38  ;;  %v1806_v29 = vld [vmem:[%s4581_s9 + $0x2a8] sm:$0xff] }
 0xa3c   :  { %v1639_v23 = vpop.permute.xlu1 %1638 }
 0xa3d   :  { %v1640_v15 = vsel %vm897_vm13, %v1637_v38, %v1639_v23  ;;  %v1791_v38 = vld [vmem:[%s4581_s9 + $0x230] sm:$0xff]  ;;  %v1790_v23 = vld [vmem:[%s4581_s9 + $0x228] sm:$0xff] }
 0xa3e   :  { %v1646_v17 = vpop.permute.xlu0 %1645 }
 0xa3f   :  { %v1662_v19 = vsel %vm907_vm14, %v1640_v15, %v1646_v17  ;;  %v1805_v15 = vld [vmem:[%s4581_s9 + $0x2a0] sm:$0xff] }
 0xa40   :  { %v1669_v36 = vcombine.low %v1661_v34, %v1662_v19  ;;  %v1648_v4 = vpop.permute.xlu1 %1647  ;;  %v1788_v34 = vld [vmem:[%s4581_s9 + $0x218] sm:$0xff]  ;;  %v1803_v19 = vld [vmem:[%s4581_s9 + $0x290] sm:$0xff] }
 0xa41   :  { %v1649_v6 = vsel %vm907_vm14, %v1646_v17, %v1648_v4  ;;  %v1789_v17 = vld [vmem:[%s4581_s9 + $0x220] sm:$0xff]  ;;  %v1802_v4 = vld [vmem:[%s4581_s9 + $0x288] sm:$0xff] }
 0xa42   :  { %v1655_v40 = vpop.permute.xlu0 %1654  ;;  %v1684_v48 = vrot.slane %v1669_v36, %v4079_v9  ;;  %v1787_v36 = vld [vmem:[%s4581_s9 + $0x210] sm:$0xff] }
 0xa43   :  { %v1663_v50 = vsel %vm4854_vm2, %v1649_v6, %v1655_v40  ;;  %v1801_v6 = vld [vmem:[%s4581_s9 + $0x280] sm:$0xff] }
 0xa44   :  { %v1657_v44 = vpop.permute.xlu1 %1656  ;;  %v1699_v57 = vcombine.low %v1677_v47, %v1684_v48  ;;  %v2169_v48 = vld [vmem:[%s4583_s11 + $0x70] sm:$0xff] }
 0xa45   :  { %v1658_v52 = vsel %vm4839_vm0, %v1655_v40, %v1657_v44  ;;  %v1698_v32 = vrot.slane %v1657_v44, %v4079_v9  ;;  %v1785_v40 = vld [vmem:[%s4581_s9 + $0x200] sm:$0xff]  ;;  %v2168_v44 = vld [vmem:[%s4583_s11 + $0x68] sm:$0xff]  ;;  %v2165_v47 = vld [vmem:[%s4583_s11 + $0x50] sm:$0xff] }
 0xa46   :  { %v1670_v56 = vcombine.low %v1663_v50, %v1658_v52  ;;  %v1707_v35 = vrot.slane %v1699_v57, %v4079_v9  ;;  %v2167_v50 = vld [vmem:[%s4583_s11 + $0x60] sm:$0xff]  ;;  %v2166_v52 = vld [vmem:[%s4583_s11 + $0x58] sm:$0xff] }
 0xa47   :  { %v2163_v57 = vld [vmem:[%s4583_s11 + $0x40] sm:$0xff] }
 0xa48   :  { %v1691_v12 = vrot.slane %v1670_v56, %v4079_v9  ;;  %v2164_v56 = vld [vmem:[%s4583_s11 + $0x48] sm:$0xff] }
 0xa4a   :  { %v1700_v27 = vcombine.low %v1691_v12, %v1698_v32  ;;  %v2162_v12 = vld [vmem:[%s4583_s11 + $0x38] sm:$0xff]  ;;  %v2161_v32 = vld [vmem:[%s4583_s11 + $0x30] sm:$0xff] }
 0xa4c   :  { %v1714_v7 = vrot.slane %v1700_v27, %v4079_v9  ;;  %v1800_v9 = vld [vmem:[%s4581_s9 + $0x278] sm:$0xff]  ;;  %v2160_v27 = vld [vmem:[%s4583_s11 + $0x28] sm:$0xff] }
 0xa4e   :  { %v1715_v58 = vcombine.low %v1707_v35, %v1714_v7  ;;  %v2159_v35 = vld [vmem:[%s4583_s11 + $0x20] sm:$0xff]  ;;  %v2158_v7 = vld [vmem:[%s4583_s11 + $0x18] sm:$0xff] }
 0xa50   :  { %1718 = vst.msk [vmem:[#allocation2 + $0x1] ss:$2 sm:$0x7f] %vm4092_vm15, %v1715_v58  ;;  %v2155_v58 = vld [vmem:[%s4583_s11] sm:$0xff] }
 0xa57   :  { %v1719_v60 = vld [vmem:[#allocation2] sm:$0xff]  ;;  %v1720_v61 = vld [vmem:[#allocation2 + $0x8] sm:$0x3f] }
 0xa58   :  { %v1837_v62 = vrot.slane %v1719_v60, %v1836_v59  ;;  %v1830_v63 = vcombine.high %v1719_v60, %v1719_v60  ;;  %v4333_v0 = vrot.slane %v1720_v61, %v1836_v59  ;;  %v1847_v22 = vcombine.high %v1720_v61, %v1720_v61 }
 0xa5a   :  { %v1845_v1 = vcombine.high %v1837_v62, %v1837_v62  ;;  %v1844_v2 = vrot.slane %v1830_v63, %v1836_v59  ;;  %v1862_v8 = vcombine.high %v4333_v0, %v4333_v0  ;;  %v1861_v37 = vrot.slane %v1847_v22, %v1836_v59  ;;  %v2261_v59 = vld [vmem:[%s4585_s13 + $0x48] sm:$0xff]  ;;  %v2259_v22 = vld [vmem:[%s4585_s13 + $0x38] sm:$0xff] }
 0xa5c   :  { %1938 = vmatprep.mubr.f32.mxu1 %v1845_v1  ;;  %v1846_v53 = vcombine.high %v1844_v2, %v1844_v2 }
 0xa5d   :  { %1939 = vmatmul.mubr.f32.vlgmr.msra.gmra.mxu1 %v1837_v62 }
 0xa5e   :  { %2523 = vmatpush3.msra.mxu1 %v1800_v9  ;;  %2008 = vmatprep.mubr.f32.mxu0 %v1846_v53  ;;  %v2410_v9 = vld [vmem:[%s4582_s10] ss:$0 sm:$0xff] }
 0xa5f   :  { %2524 = vmatprep.subr.mxu1 %v1815_v5  ;;  %2078 = vmatprep.mubr.f32.mxu1 %v1862_v8 }
 0xa60   :  { %2009 = vmatmul.mubr.f32.vlgmr.msra.gmra.mxu0 %v1844_v2  ;;  %2525 = vmatpush3.msra.mxu1 %v1799_v3 }
 0xa61   :  { %2653 = vmatpush3.msk.msra.mxu0 %vm357_vm5, %v1820_v55  ;;  %2526 = vmatprep.subr.mxu1 %v1814_v11  ;;  %vm2834_vm5 = vmmov 0  }
 0xa62   :  { %2654 = vmatprep.subr.mxu0 %v4843_v14  ;;  %2527 = vmatpush3.msra.mxu1 %v1798_v13 }
 0xa63   :  { %2655 = vmatpush3.msra.mxu0 %v1819_v16  ;;  %2528 = vmatprep.subr.mxu1 %v1813_v18 }
 0xa64   :  { %2656 = vmatprep.subr.mxu0 %v4843_v14  ;;  %2529 = vmatpush3.msra.mxu1 %v1797_v20  ;;  %v2260_v20 = vld [vmem:[%s4585_s13 + $0x40] sm:$0xff] }
 0xa65   :  { %2657 = vmatpush3.msra.mxu0 %v1818_v24  ;;  %2530 = vmatprep.subr.mxu1 %v1812_v26  ;;  %v2258_v24 = vld [vmem:[%s4585_s13 + $0x30] sm:$0xff]  ;;  %v2257_v26 = vld [vmem:[%s4585_s13 + $0x28] sm:$0xff] }
 0xa66   :  { %2658 = vmatprep.subr.mxu0 %v4843_v14  ;;  %2531 = vmatpush3.msra.mxu1 %v1796_v28  ;;  %v2256_v28 = vld [vmem:[%s4585_s13 + $0x20] sm:$0xff] }
 0xa67   :  { %2659 = vmatpush3.msra.mxu0 %v1817_v30  ;;  %2660 = vmatprep.mubr.msk.f32.mxu0 %vm2834_vm5, %v4843_v14  ;;  %v2255_v30 = vld [vmem:[%s4585_s13 + $0x18] sm:$0xff] }
 0xa68   :  { %2532 = vmatprep.subr.mxu1 %v1811_v33  ;;  %2661 = vmatmul.mubr.msk.f32.vlgmr.msra.gmra.mxu0 %vm215_vm1, %v1861_v37  ;;  %vm2177_vm1 = vcmask 982016   ;;  %v2254_v33 = vld [vmem:[%s4585_s13 + $0x10] sm:$0xff]  ;;  %v2253_v37 = vld [vmem:[%s4585_s13 + $0x8] sm:$0xff] }
 0xa69   :  { %2533 = vmatpush3.msra.mxu1 %v1795_v39  ;;  %2663 = vmatprep.subr.mxu0 %v4843_v14  ;;  %v2252_v39 = vld [vmem:[%s4585_s13] sm:$0xff] }
 0xa6a   :  { %2534 = vmatprep.subr.mxu1 %v1810_v41  ;;  %2693 = vmatprep.mubr.msk.f32.mxu0 %vm2834_vm5, %v4843_v14  ;;  %v2413_v41 = vld [vmem:[%s4584_s12] ss:$0 sm:$0xff]  ;;  %s2835_s12 = smov [#allocation3]  }
 0xa6b   :  { %2535 = vmatpush3.msra.mxu1 %v1794_v43  ;;  %2664 = vmatpush3.msra.mxu0 %v2169_v48  ;;  %s2365_s13 = sshll.u32 %s2835_s12, 4  ;;  %s2366_s13 = int_to_ptr.vmem [resolvable:$true] %s2365_s13 }
 0xa6c   :  { %2536 = vmatprep.subr.mxu1 %v1809_v45  ;;  %2665 = vmatprep.subr.mxu0 %v4843_v14  ;;  %p2799_p1 = scmp.lt.s32.totalorder %s2366_s13, %s2366_s13 }
 0xa6d   :  { %2537 = vmatpush3.msra.mxu1 %v1793_v49  ;;  %2666 = vmatpush3.msra.mxu0 %v2168_v44 }
 0xa6e   :  { %2538 = vmatprep.subr.mxu1 %v1808_v51  ;;  %2667 = vmatprep.subr.mxu0 %v4843_v14 }
 0xa6f   :  { %2539 = vmatpush3.msra.mxu1 %v1792_v25  ;;  %2668 = vmatpush3.msra.mxu0 %v2167_v50  ;;  %v2415_v25 = vld [vmem:[%s4586_s14] ss:$0 sm:$0xff]  ;;  %s2794_s14 = scalar_lea.vmem %s2366_s13, 32 }
 0xa70   :  { %2540 = vmatprep.subr.mxu1 %v1807_v42  ;;  %2669 = vmatprep.subr.mxu0 %v4843_v14  ;;  %p2795_p0 = scmp.ne.s32.totalorder %s2366_s13, %s2794_s14  ;;  %p2800_p2 = scmp.lt.s32.totalorder %s2794_s14, %s2794_s14 }
 0xa71   :  { %2541 = vmatpush3.msra.mxu1 %v1791_v38  ;;  %2670 = vmatpush3.msra.mxu0 %v2166_v52 }
 0xa72   :  { %2542 = vmatprep.subr.mxu1 %v1806_v29  ;;  %2671 = vmatprep.subr.mxu0 %v4843_v14  ;;  %p2801_p3 = por %p2800_p2, %p2799_p1 }
 0xa73   :  { %2543 = vmatpush3.msra.mxu1 %v1790_v23  ;;  %2672 = vmatpush3.msra.mxu0 %v2165_v47 }
 0xa74   :  { %2544 = vmatprep.subr.mxu1 %v1805_v15  ;;  %2673 = vmatprep.subr.mxu0 %v4843_v14  ;;  %p2802_p4 = pnand %p2801_p3, %p2795_p0 }
 0xa75   :  { %2545 = vmatpush3.msra.mxu1 %v1789_v17  ;;  %2674 = vmatpush3.msra.mxu0 %v2164_v56 }
 0xa76   :  { %2546 = vmatprep.subr.mxu1 %v1804_v46  ;;  %2675 = vmatprep.subr.mxu0 %v4843_v14 }
 0xa77   :  { %2547 = vmatpush3.msra.mxu1 %v1788_v34  ;;  %2676 = vmatpush3.msra.mxu0 %v2163_v57 }
 0xa78   :  { %2548 = vmatprep.subr.mxu1 %v1803_v19  ;;  %2677 = vmatprep.subr.mxu0 %v4843_v14 }
 0xa79   :  { %2549 = vmatpush3.msra.mxu1 %v1787_v36  ;;  %2678 = vmatpush3.msra.mxu0 %v2162_v12 }
 0xa7a   :  { %2550 = vmatprep.subr.mxu1 %v1802_v4  ;;  %2679 = vmatprep.subr.mxu0 %v4843_v14 }
 0xa7b   :  { %2551 = vmatpush3.msra.mxu1 %v1786_v31  ;;  %2680 = vmatpush3.msra.mxu0 %v2161_v32 }
 0xa7c   :  { %2552 = vmatprep.subr.mxu1 %v1801_v6  ;;  %2681 = vmatprep.subr.mxu0 %v4843_v14 }
 0xa7d   :  { %2553 = vmatpush3.msra.mxu1 %v1785_v40  ;;  %2682 = vmatpush3.msra.mxu0 %v2160_v27 }
 0xa7e   :  { %2079 = vmatmul.mubr.f32.vlgmr.msra.gmra.mxu1 %v4333_v0  ;;  %2696 = vmatprep.subr.mxu1 %v4843_v14 }
 0xa7f   :  { %2718 = vmatprep.mubr.msk.f32.mxu1 %vm2834_vm5, %v4843_v14  ;;  %2683 = vmatprep.subr.mxu0 %v4843_v14 }
 0xa80   :  { %2684 = vmatpush3.msra.mxu0 %v2159_v35  ;;  %2697 = vmatpush3.msk.msra.mxu1 %vm556_vm6, %v2262_v54  ;;  %vm4855_vm6 = vmmov %vm4840_vm4  ;;  %vm2346_vm4 = vcmask 1041408  }
 0xa81   :  { %2685 = vmatprep.subr.mxu0 %v4843_v14  ;;  %2698 = vmatprep.subr.mxu1 %v4843_v14 }
 0xa82   :  { %2686 = vmatpush3.msra.mxu0 %v2158_v7  ;;  %2699 = vmatpush3.msra.mxu1 %v2261_v59 }
 0xa83   :  { %2687 = vmatprep.subr.mxu0 %v4843_v14  ;;  %2700 = vmatprep.subr.mxu1 %v4843_v14 }
 0xa84   :  { %2688 = vmatpush3.msra.mxu0 %v2157_v21  ;;  %2701 = vmatpush3.msra.mxu1 %v2260_v20 }
 0xa85   :  { %2689 = vmatprep.subr.mxu0 %v4843_v14  ;;  %2702 = vmatprep.subr.mxu1 %v4843_v14 }
 0xa86   :  { %2690 = vmatpush3.msra.mxu0 %v2156_v10  ;;  %2703 = vmatpush3.msra.mxu1 %v2259_v22 }
 0xa87   :  { %2691 = vmatprep.subr.mxu0 %v4843_v14  ;;  %2704 = vmatprep.subr.mxu1 %v4843_v14 }
 0xa88   :  { %2692 = vmatpush3.msra.mxu0 %v2155_v58  ;;  %2705 = vmatpush3.msra.mxu1 %v2258_v24 }
 0xa89   :  { %2706 = vmatprep.subr.mxu1 %v4843_v14 }
 0xa8a   :  { %2707 = vmatpush3.msra.mxu1 %v2257_v26 }
 0xa8b   :  { %2708 = vmatprep.subr.mxu1 %v4843_v14 }
 0xa8c   :  { %2709 = vmatpush3.msra.mxu1 %v2256_v28 }
 0xa8d   :  { %2710 = vmatprep.subr.mxu1 %v4843_v14 }
 0xa8e   :  { %2711 = vmatpush3.msra.mxu1 %v2255_v30 }
 0xa8f   :  { %2712 = vmatprep.subr.mxu1 %v4843_v14 }
 0xa90   :  { %2713 = vmatpush3.msra.mxu1 %v2254_v33 }
 0xa91   :  { %2714 = vmatprep.subr.mxu1 %v4843_v14 }
 0xa92   :  { %2715 = vmatpush3.msra.mxu1 %v2253_v37 }
 0xa93   :  { %2716 = vmatprep.subr.mxu1 %v4843_v14 }
 0xa94   :  { %2717 = vmatpush3.msra.mxu1 %v2252_v39 }
 0xb1d   :  { %v2484_v0 = vpop.f32.mrf.mxu1 }
 0xb1f   :  { %v2485_v1 = vpop.f32.mrf.mxu1 }
 0xb20   :  { %v2519_v60 = vpop.f32.mrf.mxu0  ;;  %v2486_v2 = vadd.f32 %v2485_v1, %v2484_v0 }
 0xb22   :  { %v2520_v61 = vpop.f32.mrf.mxu0  ;;  %v1941_v53 = vadd.f32 %v2486_v2, %v2410_v9 }
 0xb23   :  { %v2521_v5 = vadd.f32 %v2520_v61, %v2519_v60 }
 0xb25   :  { %v2011_v55 = vadd.f32 %v2521_v5, %v1941_v53 }
 0xb28   :  { %v2150_v62 = vpop.f32.mrf.mxu0 }
 0xb2a   :  { %v2662_v63 = vpop.f32.mrf.mxu0 }
 0xb3e   :  { %v2554_v8 = vpop.f32.mrf.mxu1 }
 0xb40   :  { %v2555_v3 = vpop.f32.mrf.mxu1 }
 0xb41   :  { %v2556_v11 = vadd.f32 %v2555_v3, %v2554_v8 }
 0xb43   :  { %v2081_v13 = vadd.f32 %v2556_v11, %v2011_v55 }
 0xb45   :  { %v2151_v16 = vadd.f32 %v2150_v62, %v2081_v13 }
 0xb47   :  { %2779 = vtanh.f32 %v2151_v16 }
 0xb54   :  { %v2780_v18 = vpop.eup %2779 }
 0xb55   :  { %2694 = vmatmul.mubr.msk.f32.vlgmr.msra.gmra.mxu0 %vm2177_vm1, %v2780_v18 }
 0xc15   :  { %v2247_v43 = vpop.f32.mrf.mxu0 }
 0xc16   :  { %v2248_v45 = vadd.f32 %v2413_v41, %v2247_v43 }
 0xc17   :  { %v2695_v49 = vpop.f32.mrf.mxu0 }
 0xc18   :  { %2781 = vtanh.f32 %v2248_v45 }
 0xc25   :  { %v2782_v51 = vpop.eup %2781 }
 0xc26   :  { %2719 = vmatmul.mubr.msk.f32.vlgmr.msra.gmra.mxu1 %vm4855_vm6, %v2782_v51 }
 0xce6   :  { %v2342_v42 = vpop.f32.mrf.mxu1 }
 0xce7   :  { %v2343_v38 = vadd.f32 %v2415_v25, %v2342_v42 }
 0xce8   :  { %v2720_v14 = vpop.f32.mrf.mxu1 }
 0xce9   :  { %v2347_v29 = vsel %vm2346_vm4, %v2343_v38, -inf }
 0xcea   :  { %2348 = vmax.xlane.f32.xlu0 %v2347_v29 }
 0xd73   :  { %v2349_v23 = vpop.xlane.xlu0 %2348 }
 0xd74   :  { %v2350_v15 = vsub.f32 %v2343_v38, %v2349_v23 }
 0xd76   :  { %v2351_v17 = vmul.f32 1.442695, %v2350_v15 }
 0xd78   :  { %2783 = vpow2.f32 %v2351_v17 }
 0xd85   :  { %v2784_v46 = vpop.eup %2783 }
 0xd86   :  { %v2353_v34 = vsel %vm2346_vm4, %v2784_v46, 0.0 }
 0xd87   :  { %2354 = vadd.xlane.f32.xlu1 %v2353_v34 }
 0xe10   :  { %v2355_v19 = vpop.xlane.xlu1 %2354 }
 0xe11   :  { %2785 = vrcp.f32 %v2355_v19 }
 0xe1e   :  { %v2786_v36 = vpop.eup %2785 }
 0xe1f   :  { %v2357_v4 = vmul.f32 %v2786_v36, %v2784_v46 }
 0xe21   :  { %2358 = vst [vmem:[#allocation3] sm:$0x3] %v2357_v4 }
 0xe22   :  { %2805 = shalt.err (!%p2802_p4)
}
 0xe23   :  { %2368 = dma.vmem_to_hbm [thread:$0]  %s2366_s13, 32, %s4587_s15, [#allocation4]  }
 0xe24   :  { %2814 = dma.done.wait [#allocation4], 32  }
 0xe25   :  { %2815 = vsyncadd [#allocation4], 4294967264 }
 0xe26   :  { %2372 = vsyncpa [#allocation4], 1 }

</bundles_post_ra>
